<compile_context>
chip_gen: v5e
topology: v5e:2x2
jax: 0.10.0
libtpu: 0.0.40
codegen_flags: <defaults>
</compile_context>

<pallas_src>
import functools

import jax
import jax.numpy as jnp
from jax.experimental import pallas as pl
from jax.experimental.pallas import tpu as pltpu

LANE_TILE = 128   # TPU vreg lane width


# ----------------------------- fused Pallas kernel ---------------------------
def _fused_gcn_kernel(*refs, layer_plan, compute_dtype):
    """All 5 ChebConv(K=3) layers + ReLU / softmax fused in one kernel.

    refs = (l_ref, x_ref, <per-layer packed weight/bias refs...>, o_ref)

    layer_plan is a static tuple of (mode, f_in, f_out); per-layer params are:
      mode == "project"          : W packed along axis=1 -> [f_in(_pad), 3*f_out]
                                   (bf16), bias (f32)
      mode == "propagate_packed" : W packed along axis=0 -> [3*f_in, f_out]
                                   (bf16), bias (f32)     [requires 3*f_in<=128]
      mode == "propagate_split"  : W0, W1, W2 ([f_in, f_out] each, bf16), bias
    """
    l_ref, x_ref, o_ref = refs[0], refs[1], refs[-1]
    params = refs[2:-1]

    L = l_ref[...]                        # [N, N] scaled Laplacian (bf16)
    h = x_ref[...]                        # [N, F_in(_pad)] activations (bf16)
    n_layers = len(layer_plan)
    p = 0
    for i, (mode, f_in, f_out) in enumerate(layer_plan):
        if mode == "project":
            # F_out < F_in: project first, propagate the narrow result.
            #   out = x W0 + L (x W1) + 2 L (L (x W2)) - x W2 + b
            # Single output-packed dot for all K weights, then fused L@[z1|z2].
            wp = params[p][...]                       # [f_in_pad, 3*f_out]
            b = params[p + 1][...]                    # [1, f_out] f32
            p += 2
            zp = jnp.dot(h, wp, preferred_element_type=jnp.float32)  # [N,3*f_out]
            z0 = zp[:, :f_out]
            z2 = zp[:, 2 * f_out:]
            z12 = zp[:, f_out:]                       # [N, 2*f_out] = [z1 | z2]
            lz12 = jnp.dot(L, z12.astype(compute_dtype),
                           preferred_element_type=jnp.float32)        # [L z1|L z2]
            lz1 = lz12[:, :f_out]
            lz2 = lz12[:, f_out:]
            llz2 = jnp.dot(L, lz2.astype(compute_dtype),
                           preferred_element_type=jnp.float32)
            acc = z0 + lz1 + 2.0 * llz2 - z2 + b
        elif mode == "propagate_packed":
            # F_in <= F_out and 3*f_in <= 128: Chebyshev recurrence on the narrow
            # input, then ONE packed projection matmul over the stacked K axis.
            w = params[p][...]                        # [3*f_in, f_out]
            b = params[p + 1][...]
            p += 2
            t1 = jnp.dot(L, h, preferred_element_type=jnp.float32
                         ).astype(compute_dtype)
            t2 = (2.0 * jnp.dot(L, t1, preferred_element_type=jnp.float32)
                  - h.astype(jnp.float32)).astype(compute_dtype)
            t_cat = jnp.concatenate([h, t1, t2], axis=-1)   # <=128 lanes: 1 tile
            acc = jnp.dot(t_cat, w, preferred_element_type=jnp.float32) + b
        else:  # "propagate_split": 3*f_in > 128 -> no lane concat across a tile
            w0 = params[p][...]
            w1 = params[p + 1][...]
            w2 = params[p + 2][...]
            b = params[p + 3][...]
            p += 4
            t1 = jnp.dot(L, h, preferred_element_type=jnp.float32
                         ).astype(compute_dtype)
            t2 = (2.0 * jnp.dot(L, t1, preferred_element_type=jnp.float32)
                  - h.astype(jnp.float32)).astype(compute_dtype)
            acc = jnp.dot(h, w0, preferred_element_type=jnp.float32)
            acc = acc + jnp.dot(t1, w1, preferred_element_type=jnp.float32)
            acc = acc + jnp.dot(t2, w2, preferred_element_type=jnp.float32)
            acc = acc + b

        if i < n_layers - 1:
            h = jnp.maximum(acc, 0.0).astype(compute_dtype)   # ReLU (f32 math)
        else:
            # row-wise softmax over classes (torch F.softmax on 2-D -> dim=1).
            # Exact normalization (tiny 64x1 divide); store lane-dense padded slab.
            m = jnp.max(acc, axis=-1, keepdims=True)
            e = jnp.exp(acc - m)
            s = jnp.sum(e, axis=-1, keepdims=True)
            probs = e / s                                     # [N, num_classes]
            pad_cols = o_ref.shape[-1] - probs.shape[-1]
            if pad_cols > 0:
                probs = jnp.concatenate(
                    [probs, jnp.zeros((probs.shape[0], pad_cols), probs.dtype)],
                    axis=-1)
            o_ref[...] = probs.astype(o_ref.dtype)


# ------------------------------ host-side glue --------------------------------
def build_scaled_laplacian(edge_index, num_nodes):
    """Dense L_hat = -D^{-1/2} A D^{-1/2} (diag cancels to 0), matching
    torch_geometric ChebConv.__norm__ with normalization='sym', lambda_max=2.

    NOTE: called ONCE outside the jitted forward (edge_index static across calls)
    so per-inference work is only the fused pallas_call."""
    row, col = edge_index[0], edge_index[1]
    w = jnp.where(row != col, 1.0, 0.0).astype(jnp.float32)   # drop self loops
    adj = jnp.zeros((num_nodes, num_nodes), jnp.float32).at[row, col].add(w)
    deg = adj.sum(axis=1)
    dinv = jnp.where(deg > 0, 1.0 / jnp.sqrt(jnp.maximum(deg, 1e-12)), 0.0)
    return -(dinv[:, None] * adj * dinv[None, :])


def init_params(key, feature_size, init_filters, num_classes, k=3):
    """Deterministic glorot-uniform weights / zero biases for the 5 ChebConvs."""
    dims = [(feature_size, init_filters),
            (init_filters, 2 * init_filters),
            (2 * init_filters, 4 * init_filters),
            (4 * init_filters, 8 * init_filters),
            (8 * init_filters, num_classes)]
    params = []
    for li, (fin, fout) in enumerate(dims):
        ws = []
        for ki in range(k):
            kk = jax.random.fold_in(key, li * k + ki)
            lim = jnp.sqrt(6.0 / (fin + fout))
            ws.append(jax.random.uniform(kk, (fin, fout), jnp.float32, -lim, lim))
        b = jnp.zeros((1, fout), jnp.float32)
        params.append((ws, b))
    return params


def pack_params(params, compute_dtype=jnp.bfloat16, lane_tile=LANE_TILE):
    """Pack per-layer ChebConv weights for the fused kernel (done once, host side).

    * F_out < F_in  -> "project": K weights concatenated along OUTPUT axis
      (single MXU dot in-kernel); layer-0 contraction dim zero-padded to a
      multiple of 128 lanes.
    * F_in <= F_out and 3*F_in <= 128 -> "propagate_packed": K weights stacked
      along the contraction axis (single packed projection dot).
    * 3*F_in > 128 -> "propagate_split": keep the 3 weights separate so the
      kernel does three accumulating dots (no tile-crossing lane concat).

    Returns (flat_params, plan, x_pad_to)."""
    flat, plan = [], []
    x_pad_to = params[0][0][0].shape[0]
    for li, (ws, b) in enumerate(params):
        f_in, f_out = ws[0].shape
        if f_out < f_in:
            w_packed = jnp.concatenate(ws, axis=1)            # [f_in, 3*f_out]
            if li == 0:
                f_in_pad = ((f_in + lane_tile - 1) // lane_tile) * lane_tile
                if f_in_pad != f_in:
                    w_packed = jnp.pad(w_packed, ((0, f_in_pad - f_in), (0, 0)))
                x_pad_to = f_in_pad
            plan.append(("project", f_in, f_out))
            flat.append(w_packed.astype(compute_dtype))
            flat.append(b.astype(jnp.float32))
        elif 3 * f_in <= lane_tile:
            plan.append(("propagate_packed", f_in, f_out))
            flat.append(jnp.concatenate(ws, axis=0).astype(compute_dtype))
            flat.append(b.astype(jnp.float32))
        else:
            plan.append(("propagate_split", f_in, f_out))
            flat.extend(w.astype(compute_dtype) for w in ws)
            flat.append(b.astype(jnp.float32))
    return flat, tuple(plan), x_pad_to


def invoice_gcn_forward(packed_params, x, l_hat, *, layer_plan, num_classes,
                        x_pad_to, out_lanes=LANE_TILE,
                        compute_dtype=jnp.bfloat16):
    """Fused 5-layer ChebConv forward; one pallas_call, everything in VMEM."""
    n, f = x.shape
    if x_pad_to > f:                      # lane-dense contraction on layer 1
        x = jnp.pad(x, ((0, 0), (0, x_pad_to - f)))
    vmem = pl.BlockSpec(memory_space=pltpu.MemorySpace.VMEM)
    kernel = functools.partial(_fused_gcn_kernel, layer_plan=layer_plan,
                               compute_dtype=compute_dtype)
    # Advisory scheduling hint only; total VMEM footprint is <0.5 MiB so no
    # vmem_limit_bytes / tiling changes are needed on v5e/v6e/v7x.
    cost = pl.CostEstimate(flops=13_000_000, transcendentals=1_024,
                           bytes_accessed=400_000)
    # TODO(synk): for batched multi-graph inputs add a leading "parallel" grid
    # axis (block-diagonal L_hat, stacked node features) so both v7x TensorCores
    # are used and the MXU M dimension is filled; a single 64-node graph needs
    # neither.
    out_padded = pl.pallas_call(
        kernel,
        out_shape=jax.ShapeDtypeStruct((n, out_lanes), jnp.float32),
        in_specs=[vmem] * (2 + len(packed_params)),
        out_specs=vmem,
        cost_estimate=cost,
    )(l_hat.astype(compute_dtype), x.astype(compute_dtype), *packed_params)
    return out_padded[:, :num_classes]    # lane-dense store, slice host-side


def _reference_forward(params, x, edge_index):
    """Pure-JAX f32 reference (textbook ChebConv recurrence) for validation."""
    n = x.shape[0]
    L = build_scaled_laplacian(edge_index, n)
    h = x
    last = len(params) - 1
    for i, (ws, b) in enumerate(params):
        t0 = h
        t1 = L @ h
        t2 = 2.0 * (L @ t1) - t0
        out = t0 @ ws[0] + t1 @ ws[1] + t2 @ ws[2] + b
        h = jax.nn.relu(out) if i < last else jax.nn.softmax(out, axis=-1)
    return h


# ---------------------------------- main --------------------------------------
if __name__ == "__main__":
    N = 64            # nodes in the invoice graph
    E = 256           # directed edges (symmetrized: left/right/above/below links)
    FEATURE_SIZE = 782
    INIT_FILTERS = 16
    NUM_CLASSES = 11  # TODO(synk): numLabels comes from getConfig('GCN_based'); fixed to 11 here.

    key = jax.random.PRNGKey(0)
    kx, ks, kd, kp = jax.random.split(key, 4)

    x = jax.random.normal(kx, (N, FEATURE_SIZE), jnp.float32)
    src = jax.random.randint(ks, (E,), 0, N, dtype=jnp.int32)
    dst = jax.random.randint(kd, (E,), 0, N, dtype=jnp.int32)
    edge_index = jnp.stack([jnp.concatenate([src, dst]),
                            jnp.concatenate([dst, src])])   # [2, 2E]

    params = init_params(kp, FEATURE_SIZE, INIT_FILTERS, NUM_CLASSES)
    packed, plan, x_pad_to = pack_params(params)

    # Graph structure is static across calls -> build/cast L_hat once, outside
    # the jitted forward (per perf review).
    l_hat = build_scaled_laplacian(edge_index, N).astype(jnp.bfloat16)

    fwd = jax.jit(functools.partial(invoice_gcn_forward, layer_plan=plan,
                                    num_classes=NUM_CLASSES, x_pad_to=x_pad_to))
    out = jax.block_until_ready(fwd(packed, x, l_hat))

    assert out.shape == (N, NUM_CLASSES)
    # rows of the final softmax must sum to 1 (exact normalization now)
    assert bool(jnp.allclose(out.sum(axis=-1), 1.0, atol=1e-3))
    # bf16-matmul kernel vs f32 reference: probabilities should agree closely
    ref = _reference_forward(params, x, edge_index)
    assert bool(jnp.max(jnp.abs(out - ref)) < 0.15)
    print("KERNEL_OK")
</pallas_src>

<mosaic_0001>
module attributes {stable_mosaic.version = 11 : i64} {
  func.func @_fused_gcn_kernel(%arg0: memref<64x64xbf16, #tpu.memory_space<vmem>>, %arg1: memref<64x896xbf16, #tpu.memory_space<vmem>>, %arg2: memref<896x48xbf16, #tpu.memory_space<vmem>>, %arg3: memref<1x16xf32, #tpu.memory_space<vmem>>, %arg4: memref<48x32xbf16, #tpu.memory_space<vmem>>, %arg5: memref<1x32xf32, #tpu.memory_space<vmem>>, %arg6: memref<96x64xbf16, #tpu.memory_space<vmem>>, %arg7: memref<1x64xf32, #tpu.memory_space<vmem>>, %arg8: memref<64x128xbf16, #tpu.memory_space<vmem>>, %arg9: memref<64x128xbf16, #tpu.memory_space<vmem>>, %arg10: memref<64x128xbf16, #tpu.memory_space<vmem>>, %arg11: memref<1x128xf32, #tpu.memory_space<vmem>>, %arg12: memref<128x33xbf16, #tpu.memory_space<vmem>>, %arg13: memref<1x11xf32, #tpu.memory_space<vmem>>, %arg14: memref<64x128xf32, #tpu.memory_space<vmem>>) attributes {dimension_semantics = [], scalar_prefetch = 0 : i64, scratch_operands = 0 : i64, tpu.core_type = #tpu.core_type<tc>} {
    %c0 = arith.constant 0 : index
    %c0_0 = arith.constant 0 : index
    %0 = vector.load %arg0[%c0, %c0_0] : memref<64x64xbf16, #tpu.memory_space<vmem>>, vector<64x64xbf16>
    %c0_1 = arith.constant 0 : index
    %c0_2 = arith.constant 0 : index
    %1 = vector.load %arg1[%c0_1, %c0_2] : memref<64x896xbf16, #tpu.memory_space<vmem>>, vector<64x896xbf16>
    %c0_3 = arith.constant 0 : index
    %c0_4 = arith.constant 0 : index
    %2 = vector.load %arg2[%c0_3, %c0_4] : memref<896x48xbf16, #tpu.memory_space<vmem>>, vector<896x48xbf16>
    %c0_5 = arith.constant 0 : index
    %c0_6 = arith.constant 0 : index
    %3 = vector.load %arg3[%c0_5, %c0_6] : memref<1x16xf32, #tpu.memory_space<vmem>>, vector<1x16xf32>
    %cst = arith.constant dense<0.000000e+00> : vector<64x48xf32>
    %4 = tpu.matmul %1, %2, %cst {dimension_numbers = #tpu.dot_dimension_numbers<[1], [0], [0], [1], [0, 0, 1, 1], [], []>} : vector<64x896xbf16>, vector<896x48xbf16>, vector<64x48xf32> -> vector<64x48xf32>
    %5 = vector.extract_strided_slice %4 {offsets = [0, 0], sizes = [64, 16], strides = [1, 1]} : vector<64x48xf32> to vector<64x16xf32>
    %6 = vector.extract_strided_slice %4 {offsets = [0, 32], sizes = [64, 16], strides = [1, 1]} : vector<64x48xf32> to vector<64x16xf32>
    %7 = vector.extract_strided_slice %4 {offsets = [0, 16], sizes = [64, 32], strides = [1, 1]} : vector<64x48xf32> to vector<64x32xf32>
    %8 = arith.truncf %7 : vector<64x32xf32> to vector<64x32xbf16>
    %cst_7 = arith.constant dense<0.000000e+00> : vector<64x32xf32>
    %9 = tpu.matmul %0, %8, %cst_7 {dimension_numbers = #tpu.dot_dimension_numbers<[1], [0], [0], [1], [0, 0, 1, 1], [], []>} : vector<64x64xbf16>, vector<64x32xbf16>, vector<64x32xf32> -> vector<64x32xf32>
    %10 = vector.extract_strided_slice %9 {offsets = [0, 0], sizes = [64, 16], strides = [1, 1]} : vector<64x32xf32> to vector<64x16xf32>
    %11 = vector.extract_strided_slice %9 {offsets = [0, 16], sizes = [64, 16], strides = [1, 1]} : vector<64x32xf32> to vector<64x16xf32>
    %12 = arith.truncf %11 : vector<64x16xf32> to vector<64x16xbf16>
    %cst_8 = arith.constant dense<0.000000e+00> : vector<64x16xf32>
    %13 = tpu.matmul %0, %12, %cst_8 {dimension_numbers = #tpu.dot_dimension_numbers<[1], [0], [0], [1], [0, 0, 1, 1], [], []>} : vector<64x64xbf16>, vector<64x16xbf16>, vector<64x16xf32> -> vector<64x16xf32>
    %14 = arith.addf %5, %10 : vector<64x16xf32>
    %cst_9 = arith.constant 2.000000e+00 : f32
    %15 = vector.broadcast %cst_9 : f32 to vector<64x16xf32>
    %16 = arith.mulf %15, %13 : vector<64x16xf32>
    %17 = arith.addf %14, %16 : vector<64x16xf32>
    %18 = arith.subf %17, %6 : vector<64x16xf32>
    %19 = vector.broadcast %3 : vector<1x16xf32> to vector<64x16xf32>
    %20 = arith.addf %18, %19 : vector<64x16xf32>
    %cst_10 = arith.constant 0.000000e+00 : f32
    %21 = vector.broadcast %cst_10 : f32 to vector<64x16xf32>
    %22 = arith.maximumf %20, %21 : vector<64x16xf32>
    %23 = arith.truncf %22 : vector<64x16xf32> to vector<64x16xbf16>
    %c0_11 = arith.constant 0 : index
    %c0_12 = arith.constant 0 : index
    %24 = vector.load %arg4[%c0_11, %c0_12] : memref<48x32xbf16, #tpu.memory_space<vmem>>, vector<48x32xbf16>
    %c0_13 = arith.constant 0 : index
    %c0_14 = arith.constant 0 : index
    %25 = vector.load %arg5[%c0_13, %c0_14] : memref<1x32xf32, #tpu.memory_space<vmem>>, vector<1x32xf32>
    %cst_15 = arith.constant dense<0.000000e+00> : vector<64x16xf32>
    %26 = tpu.matmul %0, %23, %cst_15 {dimension_numbers = #tpu.dot_dimension_numbers<[1], [0], [0], [1], [0, 0, 1, 1], [], []>} : vector<64x64xbf16>, vector<64x16xbf16>, vector<64x16xf32> -> vector<64x16xf32>
    %27 = arith.truncf %26 : vector<64x16xf32> to vector<64x16xbf16>
    %cst_16 = arith.constant dense<0.000000e+00> : vector<64x16xf32>
    %28 = tpu.matmul %0, %27, %cst_16 {dimension_numbers = #tpu.dot_dimension_numbers<[1], [0], [0], [1], [0, 0, 1, 1], [], []>} : vector<64x64xbf16>, vector<64x16xbf16>, vector<64x16xf32> -> vector<64x16xf32>
    %cst_17 = arith.constant 2.000000e+00 : f32
    %29 = vector.broadcast %cst_17 : f32 to vector<64x16xf32>
    %30 = arith.mulf %29, %28 : vector<64x16xf32>
    %31 = arith.extf %23 : vector<64x16xbf16> to vector<64x16xf32>
    %32 = arith.subf %30, %31 : vector<64x16xf32>
    %33 = arith.truncf %32 : vector<64x16xf32> to vector<64x16xbf16>
    %34 = tpu.concatenate %23, %27, %33 in 1 : vector<64x16xbf16>, vector<64x16xbf16>, vector<64x16xbf16> -> vector<64x48xbf16>
    %cst_18 = arith.constant dense<0.000000e+00> : vector<64x32xf32>
    %35 = tpu.matmul %34, %24, %cst_18 {dimension_numbers = #tpu.dot_dimension_numbers<[1], [0], [0], [1], [0, 0, 1, 1], [], []>} : vector<64x48xbf16>, vector<48x32xbf16>, vector<64x32xf32> -> vector<64x32xf32>
    %36 = vector.broadcast %25 : vector<1x32xf32> to vector<64x32xf32>
    %37 = arith.addf %35, %36 : vector<64x32xf32>
    %cst_19 = arith.constant 0.000000e+00 : f32
    %38 = vector.broadcast %cst_19 : f32 to vector<64x32xf32>
    %39 = arith.maximumf %37, %38 : vector<64x32xf32>
    %40 = arith.truncf %39 : vector<64x32xf32> to vector<64x32xbf16>
    %c0_20 = arith.constant 0 : index
    %c0_21 = arith.constant 0 : index
    %41 = vector.load %arg6[%c0_20, %c0_21] : memref<96x64xbf16, #tpu.memory_space<vmem>>, vector<96x64xbf16>
    %c0_22 = arith.constant 0 : index
    %c0_23 = arith.constant 0 : index
    %42 = vector.load %arg7[%c0_22, %c0_23] : memref<1x64xf32, #tpu.memory_space<vmem>>, vector<1x64xf32>
    %cst_24 = arith.constant dense<0.000000e+00> : vector<64x32xf32>
    %43 = tpu.matmul %0, %40, %cst_24 {dimension_numbers = #tpu.dot_dimension_numbers<[1], [0], [0], [1], [0, 0, 1, 1], [], []>} : vector<64x64xbf16>, vector<64x32xbf16>, vector<64x32xf32> -> vector<64x32xf32>
    %44 = arith.truncf %43 : vector<64x32xf32> to vector<64x32xbf16>
    %cst_25 = arith.constant dense<0.000000e+00> : vector<64x32xf32>
    %45 = tpu.matmul %0, %44, %cst_25 {dimension_numbers = #tpu.dot_dimension_numbers<[1], [0], [0], [1], [0, 0, 1, 1], [], []>} : vector<64x64xbf16>, vector<64x32xbf16>, vector<64x32xf32> -> vector<64x32xf32>
    %cst_26 = arith.constant 2.000000e+00 : f32
    %46 = vector.broadcast %cst_26 : f32 to vector<64x32xf32>
    %47 = arith.mulf %46, %45 : vector<64x32xf32>
    %48 = arith.extf %40 : vector<64x32xbf16> to vector<64x32xf32>
    %49 = arith.subf %47, %48 : vector<64x32xf32>
    %50 = arith.truncf %49 : vector<64x32xf32> to vector<64x32xbf16>
    %51 = tpu.concatenate %40, %44, %50 in 1 : vector<64x32xbf16>, vector<64x32xbf16>, vector<64x32xbf16> -> vector<64x96xbf16>
    %cst_27 = arith.constant dense<0.000000e+00> : vector<64x64xf32>
    %52 = tpu.matmul %51, %41, %cst_27 {dimension_numbers = #tpu.dot_dimension_numbers<[1], [0], [0], [1], [0, 0, 1, 1], [], []>} : vector<64x96xbf16>, vector<96x64xbf16>, vector<64x64xf32> -> vector<64x64xf32>
    %53 = vector.broadcast %42 : vector<1x64xf32> to vector<64x64xf32>
    %54 = arith.addf %52, %53 : vector<64x64xf32>
    %cst_28 = arith.constant 0.000000e+00 : f32
    %55 = vector.broadcast %cst_28 : f32 to vector<64x64xf32>
    %56 = arith.maximumf %54, %55 : vector<64x64xf32>
    %57 = arith.truncf %56 : vector<64x64xf32> to vector<64x64xbf16>
    %c0_29 = arith.constant 0 : index
    %c0_30 = arith.constant 0 : index
    %58 = vector.load %arg8[%c0_29, %c0_30] : memref<64x128xbf16, #tpu.memory_space<vmem>>, vector<64x128xbf16>
    %c0_31 = arith.constant 0 : index
    %c0_32 = arith.constant 0 : index
    %59 = vector.load %arg9[%c0_31, %c0_32] : memref<64x128xbf16, #tpu.memory_space<vmem>>, vector<64x128xbf16>
    %c0_33 = arith.constant 0 : index
    %c0_34 = arith.constant 0 : index
    %60 = vector.load %arg10[%c0_33, %c0_34] : memref<64x128xbf16, #tpu.memory_space<vmem>>, vector<64x128xbf16>
    %c0_35 = arith.constant 0 : index
    %c0_36 = arith.constant 0 : index
    %61 = vector.load %arg11[%c0_35, %c0_36] : memref<1x128xf32, #tpu.memory_space<vmem>>, vector<1x128xf32>
    %cst_37 = arith.constant dense<0.000000e+00> : vector<64x64xf32>
    %62 = tpu.matmul %0, %57, %cst_37 {dimension_numbers = #tpu.dot_dimension_numbers<[1], [0], [0], [1], [0, 0, 1, 1], [], []>} : vector<64x64xbf16>, vector<64x64xbf16>, vector<64x64xf32> -> vector<64x64xf32>
    %63 = arith.truncf %62 : vector<64x64xf32> to vector<64x64xbf16>
    %cst_38 = arith.constant dense<0.000000e+00> : vector<64x64xf32>
    %64 = tpu.matmul %0, %63, %cst_38 {dimension_numbers = #tpu.dot_dimension_numbers<[1], [0], [0], [1], [0, 0, 1, 1], [], []>} : vector<64x64xbf16>, vector<64x64xbf16>, vector<64x64xf32> -> vector<64x64xf32>
    %cst_39 = arith.constant 2.000000e+00 : f32
    %65 = vector.broadcast %cst_39 : f32 to vector<64x64xf32>
    %66 = arith.mulf %65, %64 : vector<64x64xf32>
    %67 = arith.extf %57 : vector<64x64xbf16> to vector<64x64xf32>
    %68 = arith.subf %66, %67 : vector<64x64xf32>
    %69 = arith.truncf %68 : vector<64x64xf32> to vector<64x64xbf16>
    %cst_40 = arith.constant dense<0.000000e+00> : vector<64x128xf32>
    %70 = tpu.matmul %57, %58, %cst_40 {dimension_numbers = #tpu.dot_dimension_numbers<[1], [0], [0], [1], [0, 0, 1, 1], [], []>} : vector<64x64xbf16>, vector<64x128xbf16>, vector<64x128xf32> -> vector<64x128xf32>
    %cst_41 = arith.constant dense<0.000000e+00> : vector<64x128xf32>
    %71 = tpu.matmul %63, %59, %cst_41 {dimension_numbers = #tpu.dot_dimension_numbers<[1], [0], [0], [1], [0, 0, 1, 1], [], []>} : vector<64x64xbf16>, vector<64x128xbf16>, vector<64x128xf32> -> vector<64x128xf32>
    %72 = arith.addf %70, %71 : vector<64x128xf32>
    %cst_42 = arith.constant dense<0.000000e+00> : vector<64x128xf32>
    %73 = tpu.matmul %69, %60, %cst_42 {dimension_numbers = #tpu.dot_dimension_numbers<[1], [0], [0], [1], [0, 0, 1, 1], [], []>} : vector<64x64xbf16>, vector<64x128xbf16>, vector<64x128xf32> -> vector<64x128xf32>
    %74 = arith.addf %72, %73 : vector<64x128xf32>
    %75 = vector.broadcast %61 : vector<1x128xf32> to vector<64x128xf32>
    %76 = arith.addf %74, %75 : vector<64x128xf32>
    %cst_43 = arith.constant 0.000000e+00 : f32
    %77 = vector.broadcast %cst_43 : f32 to vector<64x128xf32>
    %78 = arith.maximumf %76, %77 : vector<64x128xf32>
    %79 = arith.truncf %78 : vector<64x128xf32> to vector<64x128xbf16>
    %c0_44 = arith.constant 0 : index
    %c0_45 = arith.constant 0 : index
    %80 = vector.load %arg12[%c0_44, %c0_45] : memref<128x33xbf16, #tpu.memory_space<vmem>>, vector<128x33xbf16>
    %c0_46 = arith.constant 0 : index
    %c0_47 = arith.constant 0 : index
    %81 = vector.load %arg13[%c0_46, %c0_47] : memref<1x11xf32, #tpu.memory_space<vmem>>, vector<1x11xf32>
    %cst_48 = arith.constant dense<0.000000e+00> : vector<64x33xf32>
    %82 = tpu.matmul %79, %80, %cst_48 {dimension_numbers = #tpu.dot_dimension_numbers<[1], [0], [0], [1], [0, 0, 1, 1], [], []>} : vector<64x128xbf16>, vector<128x33xbf16>, vector<64x33xf32> -> vector<64x33xf32>
    %83 = vector.extract_strided_slice %82 {offsets = [0, 0], sizes = [64, 11], strides = [1, 1]} : vector<64x33xf32> to vector<64x11xf32>
    %84 = vector.extract_strided_slice %82 {offsets = [0, 22], sizes = [64, 11], strides = [1, 1]} : vector<64x33xf32> to vector<64x11xf32>
    %85 = vector.extract_strided_slice %82 {offsets = [0, 11], sizes = [64, 22], strides = [1, 1]} : vector<64x33xf32> to vector<64x22xf32>
    %86 = arith.truncf %85 : vector<64x22xf32> to vector<64x22xbf16>
    %cst_49 = arith.constant dense<0.000000e+00> : vector<64x22xf32>
    %87 = tpu.matmul %0, %86, %cst_49 {dimension_numbers = #tpu.dot_dimension_numbers<[1], [0], [0], [1], [0, 0, 1, 1], [], []>} : vector<64x64xbf16>, vector<64x22xbf16>, vector<64x22xf32> -> vector<64x22xf32>
    %88 = vector.extract_strided_slice %87 {offsets = [0, 0], sizes = [64, 11], strides = [1, 1]} : vector<64x22xf32> to vector<64x11xf32>
    %89 = vector.extract_strided_slice %87 {offsets = [0, 11], sizes = [64, 11], strides = [1, 1]} : vector<64x22xf32> to vector<64x11xf32>
    %90 = arith.truncf %89 : vector<64x11xf32> to vector<64x11xbf16>
    %cst_50 = arith.constant dense<0.000000e+00> : vector<64x11xf32>
    %91 = tpu.matmul %0, %90, %cst_50 {dimension_numbers = #tpu.dot_dimension_numbers<[1], [0], [0], [1], [0, 0, 1, 1], [], []>} : vector<64x64xbf16>, vector<64x11xbf16>, vector<64x11xf32> -> vector<64x11xf32>
    %92 = arith.addf %83, %88 : vector<64x11xf32>
    %cst_51 = arith.constant 2.000000e+00 : f32
    %93 = vector.broadcast %cst_51 : f32 to vector<64x11xf32>
    %94 = arith.mulf %93, %91 : vector<64x11xf32>
    %95 = arith.addf %92, %94 : vector<64x11xf32>
    %96 = arith.subf %95, %84 : vector<64x11xf32>
    %97 = vector.broadcast %81 : vector<1x11xf32> to vector<64x11xf32>
    %98 = arith.addf %96, %97 : vector<64x11xf32>
    %cst_52 = arith.constant dense<0xFF800000> : vector<64xf32>
    %99 = vector.multi_reduction <maximumf>, %98, %cst_52 [1] : vector<64x11xf32> to vector<64xf32>
    %100 = vector.shape_cast %99 : vector<64xf32> to vector<64x1xf32>
    %101 = vector.broadcast %100 : vector<64x1xf32> to vector<64x11xf32>
    %102 = arith.subf %98, %101 : vector<64x11xf32>
    %103 = math.exp %102 : vector<64x11xf32>
    %cst_53 = arith.constant dense<0.000000e+00> : vector<64xf32>
    %104 = vector.multi_reduction <add>, %103, %cst_53 [1] : vector<64x11xf32> to vector<64xf32>
    %105 = vector.shape_cast %104 : vector<64xf32> to vector<64x1xf32>
    %106 = vector.broadcast %105 : vector<64x1xf32> to vector<64x11xf32>
    %107 = arith.divf %103, %106 : vector<64x11xf32>
    %cst_54 = arith.constant 0.000000e+00 : f32
    %108 = vector.broadcast %cst_54 : f32 to vector<64x117xf32>
    %109 = tpu.concatenate %107, %108 in 1 : vector<64x11xf32>, vector<64x117xf32> -> vector<64x128xf32>
    %c0_55 = arith.constant 0 : index
    %c0_56 = arith.constant 0 : index
    %110 = vector.load %arg14[%c0_55, %c0_56] : memref<64x128xf32, #tpu.memory_space<vmem>>, vector<64x128xf32>
    tpu.vector_store %arg14[%c0_55, %c0_56], %109 {strides = array<i32>} : memref<64x128xf32, #tpu.memory_space<vmem>>, vector<64x128xf32>,
    return
  }
}

</mosaic_0001>

<bundles_post_ra>
// kernel: invoice_gcn_forward.1
= control target key start
LH: loop header
LB: loop body
LE: loop exit
PB: predicated region body
PF: predicated region fallthrough
CT: control target
= control target key end

     0   :  { %vm924_vm0 = vcmask 523264   ;;  %s3263_s16 = smov 96   ;;  %s3265_s19 = smov 32   ;;  %vm1295_vm1 = vcmask 130048   ;;  %vm1308_vm2 = vcmask 261120   ;;  %vm1338_vm3 = vcmask 392192   ;;  %s4345_s2 = inlined_call_operand.vmem [shape: bf16[896,48], index: 2, kind: input, shape index: {}]   ;;  %s4346_s1 = inlined_call_operand.vmem [shape: bf16[64,896], index: 1, kind: input, shape index: {}]   ;;  %s4347_s0 = inlined_call_operand.vmem [shape: bf16[64,64], index: 0, kind: input, shape index: {}]   ;;  %s4348_s3 = inlined_call_operand.vmem [shape: f32[1,16], index: 3, kind: input, shape index: {}]   ;;  %s4349_s4 = inlined_call_operand.vmem [shape: bf16[48,32], index: 4, kind: input, shape index: {}]   ;;  %s4350_s5 = inlined_call_operand.vmem [shape: f32[1,32], index: 5, kind: input, shape index: {}]   ;;  %s4351_s6 = inlined_call_operand.vmem [shape: bf16[96,64], index: 6, kind: input, shape index: {}]   ;;  %s4352_s7 = inlined_call_operand.vmem [shape: f32[1,64], index: 7, kind: input, shape index: {}]   ;;  %s4353_s8 = inlined_call_operand.vmem [shape: bf16[64,128], index: 8, kind: input, shape index: {}]   ;;  %s4354_s9 = inlined_call_operand.vmem [shape: bf16[64,128], index: 9, kind: input, shape index: {}]   ;;  %s4355_s11 = inlined_call_operand.vmem [shape: f32[1,128], index: 11, kind: input, shape index: {}]   ;;  %s4356_s10 = inlined_call_operand.vmem [shape: bf16[64,128], index: 10, kind: input, shape index: {}]   ;;  %s4357_s12 = inlined_call_operand.vmem [shape: bf16[128,33], index: 12, kind: input, shape index: {}]   ;;  %s4358_s13 = inlined_call_operand.vmem [shape: f32[1,11], index: 13, kind: input, shape index: {}]   ;;  %s4359_s14 = inlined_call_operand.vmem [shape: f32[64,128], index: 14, kind: output, shape index: {}]  }
   0x1   :  { %v3112_v0 = vld [vmem:[%s4345_s2 + $0x38] sm:$0xff]  ;;  %v3111_v3 = vld [vmem:[%s4345_s2 + $0x30] sm:$0xff]  ;;  %v3110_v6 = vld [vmem:[%s4345_s2 + $0x28] sm:$0xff]  ;;  %vm1646_vm4 = vcmask 785408   ;;  %vm2332_vm5 = vcmask 89088  }
   0x2   :  { %v3120_v1 = vld [vmem:[%s4345_s2 + $0x78] sm:$0xff]  ;;  %681 = vmatpush.bf16.msra.mxu0 %v3112_v0  ;;  %3190 = vmatpush.bf16.msra.mxu3 %v3112_v0  ;;  %v3119_v4 = vld [vmem:[%s4345_s2 + $0x70] sm:$0xff]  ;;  %v3118_v7 = vld [vmem:[%s4345_s2 + $0x68] sm:$0xff] }
   0x3   :  { %v3128_v2 = vld [vmem:[%s4345_s2 + $0xb8] sm:$0xff]  ;;  %710 = vmatpush.bf16.msra.mxu1 %v3120_v1  ;;  %v3127_v5 = vld [vmem:[%s4345_s2 + $0xb0] sm:$0xff]  ;;  %v3126_v8 = vld [vmem:[%s4345_s2 + $0xa8] sm:$0xff] }
   0x4   :  { %739 = vmatpush.bf16.msra.mxu2 %v3128_v2  ;;  %v3109_v9 = vld [vmem:[%s4345_s2 + $0x20] sm:$0xff]  ;;  %v3108_v12 = vld [vmem:[%s4345_s2 + $0x18] sm:$0xff]  ;;  %v3107_v15 = vld [vmem:[%s4345_s2 + $0x10] sm:$0xff] }
   0x5   :  { %v3117_v10 = vld [vmem:[%s4345_s2 + $0x60] sm:$0xff]  ;;  %v3116_v13 = vld [vmem:[%s4345_s2 + $0x58] sm:$0xff]  ;;  %v3115_v16 = vld [vmem:[%s4345_s2 + $0x50] sm:$0xff] }
   0x6   :  { %682 = vmatpush.bf16.msra.mxu0 %v3111_v3  ;;  %3191 = vmatpush.bf16.msra.mxu3 %v3111_v3  ;;  %v3125_v11 = vld [vmem:[%s4345_s2 + $0xa0] sm:$0xff]  ;;  %v3124_v14 = vld [vmem:[%s4345_s2 + $0x98] sm:$0xff]  ;;  %v3123_v17 = vld [vmem:[%s4345_s2 + $0x90] sm:$0xff] }
   0x7   :  { %711 = vmatpush.bf16.msra.mxu1 %v3119_v4  ;;  %v3106_v18 = vld [vmem:[%s4345_s2 + $0x8] sm:$0xff]  ;;  %v3105_v21 = vld [vmem:[%s4345_s2] sm:$0xff]  ;;  %v3080_v25 = vld [vmem:[%s4346_s1 + $0x18] sm:$0xf0] }
   0x8   :  { %740 = vmatpush.bf16.msra.mxu2 %v3127_v5  ;;  %v3114_v19 = vld [vmem:[%s4345_s2 + $0x48] sm:$0xff]  ;;  %v3113_v22 = vld [vmem:[%s4345_s2 + $0x40] sm:$0xff]  ;;  %v2603_v26 = vld [vmem:[%s4346_s1 + $0x70] sm:$0xf] }
   0x9   :  { %v3122_v20 = vld [vmem:[%s4345_s2 + $0x88] sm:$0xff]  ;;  %v3121_v23 = vld [vmem:[%s4345_s2 + $0x80] sm:$0xff]  ;;  %v3136_v32 = vld [vmem:[%s4345_s2 + $0xf8] sm:$0xff] }
   0xa   :  { %683 = vmatpush.bf16.msra.mxu0 %v3110_v6  ;;  %3192 = vmatpush.bf16.msra.mxu3 %v3110_v6  ;;  %v2547_v24 = vld [vmem:[%s4346_s1] sm:$0xf]  ;;  %v3094_v27 = vld [vmem:[%s4346_s1 + $0x88] sm:$0xf0]  ;;  %v3077_v28 = vld [vmem:[%s4346_s1 + $0x4] sm:$0xf] }
   0xb   :  { %712 = vmatpush.bf16.msra.mxu1 %v3118_v7  ;;  %v2549_v29 = vld [vmem:[%s4346_s1 + $0x1c] sm:$0xf0]  ;;  %v2555_v30 = vld [vmem:[%s4346_s1 + $0x8] sm:$0xf]  ;;  %v3081_v31 = vld [vmem:[%s4346_s1 + $0x20] sm:$0xf0]  ;;  %v2548_v34 = vor.u32 %v3080_v25, %v2547_v24  ;;  %v2604_v35 = vor.u32 %v3094_v27, %v2603_v26 }
   0xc   :  { %741 = vmatpush.bf16.msra.mxu2 %v3126_v8  ;;  %v3144_v33 = vld [vmem:[%s4345_s2 + $0x138] sm:$0xff]  ;;  %v2552_v36 = vor.u32 %v3077_v28, %v2549_v29  ;;  %v2556_v37 = vor.u32 %v3081_v31, %v2555_v30  ;;  %v3135_v38 = vld [vmem:[%s4345_s2 + $0xf0] sm:$0xff]  ;;  %v3134_v44 = vld [vmem:[%s4345_s2 + $0xe8] sm:$0xff] }
   0xd   :  { %v3143_v39 = vld [vmem:[%s4345_s2 + $0x130] sm:$0xff]  ;;  %v3455_v40 = vld [vmem:[%s4345_s2 + $0x178] sm:$0xff]  ;;  %v3142_v45 = vld [vmem:[%s4345_s2 + $0x128] sm:$0xff] }
   0xe   :  { %684 = vmatpush.bf16.msra.mxu0 %v3109_v9  ;;  %3193 = vmatpush.bf16.msra.mxu3 %v3109_v9  ;;  %v3460_v41 = vld [vmem:[%s4345_s2 + $0x1b8] sm:$0xff]  ;;  %v3467_v42 = vld [vmem:[%s4345_s2 + $0x170] sm:$0xff]  ;;  %v3485_v46 = vld [vmem:[%s4345_s2 + $0x168] sm:$0xff] }
   0xf   :  { %713 = vmatpush.bf16.msra.mxu1 %v3117_v10  ;;  %v3472_v43 = vld [vmem:[%s4345_s2 + $0x1b0] sm:$0xff]  ;;  %v3490_v47 = vld [vmem:[%s4345_s2 + $0x1a8] sm:$0xff]  ;;  %v3133_v48 = vld [vmem:[%s4345_s2 + $0xe0] sm:$0xff] }
  0x10   :  { %742 = vmatpush.bf16.msra.mxu2 %v3125_v11  ;;  %v3141_v49 = vld [vmem:[%s4345_s2 + $0x120] sm:$0xff]  ;;  %v2575_v50 = vld [vmem:[%s4346_s1 + $0x38] sm:$0xf]  ;;  %v3087_v51 = vld [vmem:[%s4346_s1 + $0x50] sm:$0xf0] }
  0x11   :  { %v2631_v52 = vld [vmem:[%s4346_s1 + $0xa8] sm:$0xf]  ;;  %v3101_v53 = vld [vmem:[%s4346_s1 + $0xc0] sm:$0xf0]  ;;  %v3084_v54 = vld [vmem:[%s4346_s1 + $0x3c] sm:$0xf]  ;;  %v2576_v62 = vor.u32 %v3087_v51, %v2575_v50 }
  0x12   :  { %685 = vmatpush.bf16.msra.mxu0 %v3108_v12  ;;  %3194 = vmatpush.bf16.msra.mxu3 %v3108_v12  ;;  %v2577_v55 = vld [vmem:[%s4346_s1 + $0x54] sm:$0xf0]  ;;  %v2583_v56 = vld [vmem:[%s4346_s1 + $0x40] sm:$0xf]  ;;  %v3088_v57 = vld [vmem:[%s4346_s1 + $0x58] sm:$0xf0]  ;;  %v2632_v63 = vor.u32 %v3101_v53, %v2631_v52 }
  0x13   :  { %714 = vmatpush.bf16.msra.mxu1 %v3116_v13  ;;  %v3527_v58 = vld [vmem:[%s4345_s2 + $0x160] sm:$0xff]  ;;  %v3132_v60 = vld [vmem:[%s4345_s2 + $0xd8] sm:$0xff]  ;;  %v2580_v0 = vor.u32 %v3084_v54, %v2577_v55  ;;  %v2584_v1 = vor.u32 %v3088_v57, %v2583_v56  ;;  %v3131_v2 = vld [vmem:[%s4345_s2 + $0xd0] sm:$0xff] }
  0x14   :  { %743 = vmatpush.bf16.msra.mxu2 %v3124_v14  ;;  %v3532_v59 = vld [vmem:[%s4345_s2 + $0x1a0] sm:$0xff]  ;;  %v3140_v61 = vld [vmem:[%s4345_s2 + $0x118] sm:$0xff]  ;;  %v3139_v3 = vld [vmem:[%s4345_s2 + $0x110] sm:$0xff] }
  0x15   :  { %v3551_v4 = vld [vmem:[%s4345_s2 + $0x158] sm:$0xff]  ;;  %v3563_v6 = vld [vmem:[%s4345_s2 + $0x150] sm:$0xff]  ;;  %v3130_v8 = vld [vmem:[%s4345_s2 + $0xc8] sm:$0xff] }
  0x16   :  { %686 = vmatpush.bf16.msra.mxu0 %v3107_v15  ;;  %3195 = vmatpush.bf16.msra.mxu3 %v3107_v15  ;;  %v3556_v5 = vld [vmem:[%s4345_s2 + $0x198] sm:$0xff]  ;;  %v3568_v7 = vld [vmem:[%s4345_s2 + $0x190] sm:$0xff]  ;;  %v3138_v9 = vld [vmem:[%s4345_s2 + $0x108] sm:$0xff] }
  0x17   :  { %715 = vmatpush.bf16.msra.mxu1 %v3115_v16  ;;  %v3146_v10 = vld [vmem:[%s4345_s2 + $0x148] sm:$0xff]  ;;  %v3129_v12 = vld [vmem:[%s4345_s2 + $0xc0] sm:$0xff]  ;;  %v3091_v14 = vld [vmem:[%s4346_s1 + $0x74] sm:$0xf] }
  0x18   :  { %744 = vmatpush.bf16.msra.mxu2 %v3123_v17  ;;  %v3154_v11 = vld [vmem:[%s4345_s2 + $0x188] sm:$0xff]  ;;  %v3137_v13 = vld [vmem:[%s4345_s2 + $0x100] sm:$0xff]  ;;  %v2605_v15 = vld [vmem:[%s4346_s1 + $0x8c] sm:$0xf0] }
  0x19   :  { %v2611_v16 = vld [vmem:[%s4346_s1 + $0x78] sm:$0xf]  ;;  %v3078_v17 = vld [vmem:[%s4346_s1 + $0xc] sm:$0xf]  ;;  %v2608_v26 = vor.u32 %v3091_v14, %v2605_v15  ;;  %v3085_v29 = vld [vmem:[%s4346_s1 + $0x44] sm:$0xf] }
  0x1a   :  { %687 = vmatpush.bf16.msra.mxu0 %v3106_v18  ;;  %3196 = vmatpush.bf16.msra.mxu3 %v3106_v18  ;;  %v2557_v18 = vld [vmem:[%s4346_s1 + $0x24] sm:$0xf0]  ;;  %v3098_v28 = vld [vmem:[%s4346_s1 + $0xac] sm:$0xf]  ;;  %v2585_v30 = vld [vmem:[%s4346_s1 + $0x5c] sm:$0xf0] }
  0x1b   :  { %716 = vmatpush.bf16.msra.mxu1 %v3114_v19  ;;  %v2563_v19 = vld [vmem:[%s4346_s1 + $0x10] sm:$0xf]  ;;  %v2560_v24 = vor.u32 %v3078_v17, %v2557_v18  ;;  %v2591_v31 = vld [vmem:[%s4346_s1 + $0x48] sm:$0xf]  ;;  %v3099_v52 = vld [vmem:[%s4346_s1 + $0xb4] sm:$0xf] }
  0x1c   :  { %745 = vmatpush.bf16.msra.mxu2 %v3122_v20  ;;  %v3082_v20 = vld [vmem:[%s4346_s1 + $0x28] sm:$0xf0]  ;;  %v2641_v53 = vld [vmem:[%s4346_s1 + $0xcc] sm:$0xf0]  ;;  %v2647_v54 = vld [vmem:[%s4346_s1 + $0xb8] sm:$0xf] }
  0x1d   :  { %v2564_v25 = vor.u32 %v3082_v20, %v2563_v19  ;;  %v3103_v55 = vld [vmem:[%s4346_s1 + $0xd0] sm:$0xf0]  ;;  %v3093_v56 = vld [vmem:[%s4346_s1 + $0x84] sm:$0xf]  ;;  %v2621_v57 = vld [vmem:[%s4346_s1 + $0x9c] sm:$0xf0] }
  0x1e   :  { %688 = vmatpush.bf16.msra.mxu0 %v3105_v21  ;;  %3197 = vmatpush.bf16.msra.mxu3 %v3105_v21  ;;  %v3095_v21 = vld [vmem:[%s4346_s1 + $0x90] sm:$0xf0] }
  0x1f   :  { %717 = vmatpush.bf16.msra.mxu1 %v3113_v22  ;;  %v3145_v22 = vld [vmem:[%s4345_s2 + $0x140] sm:$0xff]  ;;  %v2612_v27 = vor.u32 %v3095_v21, %v2611_v16 }
  0x20   :  { %746 = vmatpush.bf16.msra.mxu2 %v3121_v23  ;;  %v3153_v23 = vld [vmem:[%s4345_s2 + $0x180] sm:$0xff] }
  0x21   :  { %689 = vmatmul.bf16.vlgmr.msra.gmra.mxu0 %v2548_v34  ;;  %699 = vmatmul.bf16.vlgmr.msra.gmra.mxu3 %v2604_v35  ;;  %v2639_v34 = vld [vmem:[%s4346_s1 + $0xb0] sm:$0xf]  ;;  %v3102_v35 = vld [vmem:[%s4346_s1 + $0xc8] sm:$0xf0] }
  0x22   :  { %768 = vmatpush.bf16.msrb.mxu3 %v3136_v32  ;;  %797 = vmatpush.bf16.msrb.mxu0 %v3144_v33  ;;  %v3089_v32 = vld [vmem:[%s4346_s1 + $0x60] sm:$0xf0]  ;;  %v2633_v33 = vld [vmem:[%s4346_s1 + $0xc4] sm:$0xf0] }
  0x23   :  { %718 = vmatmul.bf16.vlgmr.msra.gmra.mxu1 %v2552_v36  ;;  %747 = vmatmul.bf16.vlgmr.msra.gmra.mxu2 %v2556_v37  ;;  %v2588_v36 = vor.u32 %v3085_v29, %v2585_v30  ;;  %v2592_v37 = vor.u32 %v3089_v32, %v2591_v31 }
  0x24   :  { %3198 = vmatpush.bf16.msrb.mxu1 %v3455_v40  ;;  %855 = vmatpush.bf16.msrb.mxu2 %v3460_v41 }
  0x26   :  { %769 = vmatpush.bf16.msrb.mxu3 %v3135_v38  ;;  %798 = vmatpush.bf16.msrb.mxu0 %v3143_v39  ;;  %v2636_v38 = vor.u32 %v3098_v28, %v2633_v33  ;;  %v2640_v39 = vor.u32 %v3102_v35, %v2639_v34 }
  0x28   :  { %3199 = vmatpush.bf16.msrb.mxu1 %v3467_v42  ;;  %856 = vmatpush.bf16.msrb.mxu2 %v3472_v43 }
  0x2a   :  { %770 = vmatpush.bf16.msrb.mxu3 %v3134_v44  ;;  %799 = vmatpush.bf16.msrb.mxu0 %v3142_v45  ;;  %v3086_v44 = vld [vmem:[%s4346_s1 + $0x4c] sm:$0xf]  ;;  %v2593_v45 = vld [vmem:[%s4346_s1 + $0x64] sm:$0xf0] }
  0x2b   :  { %v2596_v50 = vor.u32 %v3086_v44, %v2593_v45 }
  0x2c   :  { %3200 = vmatpush.bf16.msrb.mxu1 %v3485_v46  ;;  %857 = vmatpush.bf16.msrb.mxu2 %v3490_v47 }
  0x2e   :  { %771 = vmatpush.bf16.msrb.mxu3 %v3133_v48  ;;  %800 = vmatpush.bf16.msrb.mxu0 %v3141_v49 }
  0x30   :  { %3201 = vmatpush.bf16.msrb.mxu1 %v3527_v58  ;;  %858 = vmatpush.bf16.msrb.mxu2 %v3532_v59 }
  0x31   :  { %694 = vmatmul.bf16.gmra.mxu0 %v2576_v62  ;;  %704 = vmatmul.bf16.gmra.mxu3 %v2632_v63  ;;  %v2624_v62 = vor.u32 %v3093_v56, %v2621_v57 }
  0x32   :  { %772 = vmatpush.bf16.msrb.mxu3 %v3132_v60  ;;  %801 = vmatpush.bf16.msrb.mxu0 %v3140_v61  ;;  %v2644_v60 = vor.u32 %v3099_v52, %v2641_v53  ;;  %v2648_v61 = vor.u32 %v3103_v55, %v2647_v54 }
  0x33   :  { %723 = vmatmul.bf16.gmra.mxu1 %v2580_v0  ;;  %752 = vmatmul.bf16.gmra.mxu2 %v2584_v1  ;;  %v3079_v0 = vld [vmem:[%s4346_s1 + $0x14] sm:$0xf]  ;;  %v2565_v1 = vld [vmem:[%s4346_s1 + $0x2c] sm:$0xf0] }
  0x34   :  { %3202 = vmatpush.bf16.msrb.mxu1 %v3551_v4  ;;  %859 = vmatpush.bf16.msrb.mxu2 %v3556_v5 }
  0x36   :  { %773 = vmatpush.bf16.msrb.mxu3 %v3131_v2  ;;  %802 = vmatpush.bf16.msrb.mxu0 %v3139_v3  ;;  %v3100_v2 = vld [vmem:[%s4346_s1 + $0xbc] sm:$0xf]  ;;  %v2655_v3 = vld [vmem:[%s4346_s1 + $0xc0] sm:$0xf] }
  0x38   :  { %3203 = vmatpush.bf16.msrb.mxu1 %v3563_v6  ;;  %860 = vmatpush.bf16.msrb.mxu2 %v3568_v7 }
  0x3a   :  { %774 = vmatpush.bf16.msrb.mxu3 %v3130_v8  ;;  %803 = vmatpush.bf16.msrb.mxu0 %v3138_v9  ;;  %v2568_v8 = vor.u32 %v3079_v0, %v2565_v1 }
  0x3c   :  { %3204 = vmatpush.bf16.msrb.mxu1 %v3146_v10  ;;  %861 = vmatpush.bf16.msrb.mxu2 %v3154_v11 }
  0x3e   :  { %775 = vmatpush.bf16.msrb.mxu3 %v3129_v12  ;;  %804 = vmatpush.bf16.msrb.mxu0 %v3137_v13 }
  0x40   :  { %3205 = vmatpush.bf16.msrb.mxu1 %v3145_v22  ;;  %862 = vmatpush.bf16.msrb.mxu2 %v3153_v23 }
  0x41   :  { %776 = vmatmul.bf16.vlgmr.msrb.gmra.mxu3 %v2560_v24  ;;  %805 = vmatmul.bf16.vlgmr.msrb.gmra.mxu0 %v2564_v25 }
  0x42   :  { %826 = vmatpush.bf16.msra.mxu0 %v3455_v40  ;;  %3206 = vmatpush.bf16.msra.mxu3 %v3460_v41  ;;  %v3092_v40 = vld [vmem:[%s4346_s1 + $0x7c] sm:$0xf]  ;;  %v2613_v41 = vld [vmem:[%s4346_s1 + $0x94] sm:$0xf0] }
  0x43   :  { %728 = vmatmul.bf16.gmra.mxu1 %v2608_v26  ;;  %757 = vmatmul.bf16.gmra.mxu2 %v2612_v27  ;;  %v2616_v48 = vor.u32 %v3092_v40, %v2613_v41 }
  0x46   :  { %827 = vmatpush.bf16.msra.mxu0 %v3467_v42  ;;  %3207 = vmatpush.bf16.msra.mxu3 %v3472_v43  ;;  %v2619_v42 = vld [vmem:[%s4346_s1 + $0x80] sm:$0xf]  ;;  %v3096_v43 = vld [vmem:[%s4346_s1 + $0x98] sm:$0xf0] }
  0x47   :  { %v2620_v49 = vor.u32 %v3096_v43, %v2619_v42 }
  0x4a   :  { %828 = vmatpush.bf16.msra.mxu0 %v3485_v46  ;;  %3208 = vmatpush.bf16.msra.mxu3 %v3490_v47  ;;  %v2571_v46 = vld [vmem:[%s4346_s1 + $0x18] sm:$0xf]  ;;  %v3083_v47 = vld [vmem:[%s4346_s1 + $0x30] sm:$0xf0] }
  0x4b   :  { %v2572_v51 = vor.u32 %v3083_v47, %v2571_v46 }
  0x4e   :  { %829 = vmatpush.bf16.msra.mxu0 %v3527_v58  ;;  %3209 = vmatpush.bf16.msra.mxu3 %v3532_v59  ;;  %v2599_v58 = vld [vmem:[%s4346_s1 + $0x50] sm:$0xf]  ;;  %v3090_v59 = vld [vmem:[%s4346_s1 + $0x68] sm:$0xf0] }
  0x4f   :  { %v2600_v63 = vor.u32 %v3090_v59, %v2599_v58 }
  0x51   :  { %781 = vmatmul.bf16.gmra.mxu3 %v2588_v36  ;;  %810 = vmatmul.bf16.gmra.mxu0 %v2592_v37 }
  0x52   :  { %830 = vmatpush.bf16.msra.mxu0 %v3551_v4  ;;  %3210 = vmatpush.bf16.msra.mxu3 %v3556_v5  ;;  %v3104_v4 = vld [vmem:[%s4346_s1 + $0xd8] sm:$0xf0]  ;;  %v2649_v5 = vld [vmem:[%s4346_s1 + $0xd4] sm:$0xf0] }
  0x53   :  { %733 = vmatmul.bf16.gmra.mxu1 %v2636_v38  ;;  %762 = vmatmul.bf16.gmra.mxu2 %v2640_v39  ;;  %v2656_v9 = vor.u32 %v3104_v4, %v2655_v3 }
  0x56   :  { %831 = vmatpush.bf16.msra.mxu0 %v3563_v6  ;;  %3211 = vmatpush.bf16.msra.mxu3 %v3568_v7  ;;  %v2627_v6 = vld [vmem:[%s4346_s1 + $0x88] sm:$0xf]  ;;  %v3097_v7 = vld [vmem:[%s4346_s1 + $0xa0] sm:$0xf0]  ;;  %s3262_s1 = smov 112  }
  0x5a   :  { %832 = vmatpush.bf16.msra.mxu0 %v3146_v10  ;;  %3212 = vmatpush.bf16.msra.mxu3 %v3154_v11  ;;  %v2652_v10 = vor.u32 %v3100_v2, %v2649_v5  ;;  %v2628_v11 = vor.u32 %v3097_v7, %v2627_v6 }
  0x5e   :  { %833 = vmatpush.bf16.msra.mxu0 %v3145_v22  ;;  %3213 = vmatpush.bf16.msra.mxu3 %v3153_v23 }
  0x61   :  { %786 = vmatmul.bf16.gmra.mxu3 %v2616_v48  ;;  %815 = vmatmul.bf16.gmra.mxu0 %v2620_v49 }
  0x63   :  { %839 = vmatmul.bf16.vlgmr.msrb.gmra.mxu1 %v2596_v50  ;;  %863 = vmatmul.bf16.vlgmr.msrb.gmra.mxu2 %v2572_v51 }
  0x71   :  { %791 = vmatmul.bf16.gmra.mxu3 %v2644_v60  ;;  %820 = vmatmul.bf16.gmra.mxu0 %v2648_v61 }
  0x73   :  { %844 = vmatmul.bf16.gmra.mxu1 %v2624_v62  ;;  %868 = vmatmul.bf16.gmra.mxu2 %v2600_v63 }
  0x81   :  { %834 = vmatmul.bf16.vlgmr.msra.gmra.mxu0 %v2568_v8  ;;  %878 = vmatmul.bf16.vlgmr.msra.gmra.mxu3 %v2656_v9 }
  0x83   :  { %849 = vmatmul.bf16.gmra.mxu1 %v2652_v10  ;;  %873 = vmatmul.bf16.gmra.mxu2 %v2628_v11 }
  0x9e   :  { %v690_v12 = vpop.f32.mrf.mxu0 }
  0xa0   :  { %v719_v13 = vpop.f32.mrf.mxu1 }
  0xa1   :  { %v720_v14 = vadd.f32 %v719_v13, %v690_v12 }
  0xa4   :  { %v700_v15 = vpop.f32.mrf.mxu3 }
  0xa6   :  { %v748_v16 = vpop.f32.mrf.mxu2  ;;  %v692_v18 = vpop.f32.mrf.mxu0 }
  0xa7   :  { %v749_v17 = vadd.f32 %v748_v16, %v720_v14 }
  0xa8   :  { %v721_v19 = vpop.f32.mrf.mxu1 }
  0xa9   :  { %v722_v11 = vadd.f32 %v721_v19, %v692_v18 }
  0xac   :  { %v3728_v20 = vpop.f32.mrf.mxu3 }
  0xae   :  { %v750_v21 = vpop.f32.mrf.mxu2  ;;  %v695_v22 = vpop.f32.mrf.mxu0 }
  0xaf   :  { %v751_v16 = vadd.f32 %v750_v21, %v722_v11 }
  0xb0   :  { %v724_v23 = vpop.f32.mrf.mxu1 }
  0xb1   :  { %v725_v24 = vadd.f32 %v724_v23, %v695_v22 }
  0xb4   :  { %v705_v25 = vpop.f32.mrf.mxu3 }
  0xb6   :  { %v753_v26 = vpop.f32.mrf.mxu2  ;;  %v697_v28 = vpop.f32.mrf.mxu0 }
  0xb7   :  { %v754_v27 = vadd.f32 %v753_v26, %v725_v24 }
  0xb8   :  { %v726_v29 = vpop.f32.mrf.mxu1 }
  0xb9   :  { %v727_v62 = vadd.f32 %v726_v29, %v697_v28 }
  0xbc   :  { %v707_v30 = vpop.f32.mrf.mxu3 }
  0xbe   :  { %v755_v31 = vpop.f32.mrf.mxu2  ;;  %v806_v32 = vpop.f32.mrf.mxu0 }
  0xbf   :  { %v756_v63 = vadd.f32 %v755_v31, %v727_v62  ;;  %v3782_v62 = vld [vmem:[%s4347_s0 + $0x10] sm:$0xff] }
  0xc0   :  { %v729_v33 = vpop.f32.mrf.mxu1 }
  0xc1   :  { %v730_v34 = vadd.f32 %v729_v33, %v700_v15 }
  0xc4   :  { %v777_v35 = vpop.f32.mrf.mxu3 }
  0xc5   :  { %v778_v37 = vadd.f32 %v777_v35, %v749_v17 }
  0xc6   :  { %v758_v36 = vpop.f32.mrf.mxu2  ;;  %v808_v39 = vpop.f32.mrf.mxu0 }
  0xc7   :  { %v3730_v38 = vadd.f32 %v758_v36, %v730_v34  ;;  %v807_v41 = vadd.f32 %v806_v32, %v778_v37 }
  0xc8   :  { %v731_v40 = vpop.f32.mrf.mxu1 }
  0xc9   :  { %v732_v33 = vadd.f32 %v731_v40, %v3728_v20 }
  0xcc   :  { %v779_v42 = vpop.f32.mrf.mxu3 }
  0xcd   :  { %v780_v23 = vadd.f32 %v779_v42, %v751_v16 }
  0xce   :  { %v760_v43 = vpop.f32.mrf.mxu2  ;;  %v811_v44 = vpop.f32.mrf.mxu0 }
  0xcf   :  { %v809_v32 = vadd.f32 %v808_v39, %v780_v23  ;;  %v761_v36 = vadd.f32 %v760_v43, %v732_v33 }
  0xd0   :  { %v734_v45 = vpop.f32.mrf.mxu1 }
  0xd1   :  { %v735_v24 = vadd.f32 %v734_v45, %v705_v25 }
  0xd4   :  { %v782_v46 = vpop.f32.mrf.mxu3 }
  0xd5   :  { %v783_v2 = vadd.f32 %v782_v46, %v754_v27 }
  0xd6   :  { %v763_v47 = vpop.f32.mrf.mxu2  ;;  %v813_v48 = vpop.f32.mrf.mxu0 }
  0xd7   :  { %v812_v6 = vadd.f32 %v811_v44, %v783_v2  ;;  %v764_v27 = vadd.f32 %v763_v47, %v735_v24 }
  0xd8   :  { %v736_v49 = vpop.f32.mrf.mxu1 }
  0xd9   :  { %v737_v26 = vadd.f32 %v736_v49, %v707_v30 }
  0xdc   :  { %v784_v50 = vpop.f32.mrf.mxu3 }
  0xdd   :  { %v785_v3 = vadd.f32 %v784_v50, %v756_v63  ;;  %v3789_v63 = vld [vmem:[%s4347_s0 + $0x18] sm:$0xff] }
  0xde   :  { %v765_v51 = vpop.f32.mrf.mxu2  ;;  %v3732_v52 = vpop.f32.mrf.mxu0 }
  0xdf   :  { %v814_v7 = vadd.f32 %v813_v48, %v785_v3  ;;  %v766_v28 = vadd.f32 %v765_v51, %v737_v26 }
  0xe0   :  { %v840_v53 = vpop.f32.mrf.mxu1 }
  0xe1   :  { %v841_v8 = vadd.f32 %v840_v53, %v812_v6 }
  0xe4   :  { %v787_v54 = vpop.f32.mrf.mxu3 }
  0xe5   :  { %v788_v20 = vadd.f32 %v787_v54, %v3730_v38 }
  0xe6   :  { %v864_v55 = vpop.f32.mrf.mxu2  ;;  %v818_v56 = vpop.f32.mrf.mxu0 }
  0xe7   :  { %v817_v51 = vadd.f32 %v3732_v52, %v788_v20 }
  0xe8   :  { %v842_v57 = vpop.f32.mrf.mxu1 }
  0xe9   :  { %v843_v9 = vadd.f32 %v842_v57, %v814_v7 }
  0xec   :  { %v789_v58 = vpop.f32.mrf.mxu3 }
  0xed   :  { %v790_v45 = vadd.f32 %v789_v58, %v761_v36 }
  0xee   :  { %v866_v59 = vpop.f32.mrf.mxu2  ;;  %v821_v60 = vpop.f32.mrf.mxu0 }
  0xef   :  { %v819_v43 = vadd.f32 %v818_v56, %v790_v45 }
  0xf0   :  { %v845_v61 = vpop.f32.mrf.mxu1 }
  0xf4   :  { %v792_v0 = vpop.f32.mrf.mxu3 }
  0xf5   :  { %v793_v19 = vadd.f32 %v792_v0, %v764_v27 }
  0xf6   :  { %v869_v1 = vpop.f32.mrf.mxu2  ;;  %v823_v4 = vpop.f32.mrf.mxu0 }
  0xf7   :  { %v3734_v13 = vadd.f32 %v869_v1, %v841_v8  ;;  %v822_v25 = vadd.f32 %v821_v60, %v793_v19  ;;  %v3768_v60 = vld [vmem:[%s4347_s0] sm:$0xff] }
  0xf8   :  { %v847_v5 = vpop.f32.mrf.mxu1 }
  0xf9   :  { %v848_v53 = vadd.f32 %v847_v5, %v819_v43 }
  0xfc   :  { %v794_v10 = vpop.f32.mrf.mxu3 }
  0xfd   :  { %v795_v29 = vadd.f32 %v794_v10, %v766_v28 }
  0xfe   :  { %v871_v12 = vpop.f32.mrf.mxu2  ;;  %v835_v15 = vpop.f32.mrf.mxu0 }
  0xff   :  { %v3736_v14 = vadd.f32 %v871_v12, %v843_v9  ;;  %v836_v31 = vadd.f32 %v835_v15, %v807_v41  ;;  %v824_v44 = vadd.f32 %v823_v4, %v795_v29 }
 0x100   :  { %v850_v17 = vpop.f32.mrf.mxu1 }
 0x101   :  { %v885_v22 = vpack.c.bf16 %v3736_v14, %v3734_v13  ;;  %v3742_v42 = vadd.f32 %v864_v55, %v836_v31  ;;  %v851_v46 = vadd.f32 %v850_v17, %v822_v25  ;;  %v846_v55 = vadd.f32 %v845_v61, %v817_v51  ;;  %v3775_v61 = vld [vmem:[%s4347_s0 + $0x8] sm:$0xff] }
 0x103   :  { %914 = vrot.lane.b32.xlu1 %v885_v22, %s3262_s1 }
 0x104   :  { %v879_v18 = vpop.f32.mrf.mxu3 }
 0x105   :  { %v3749_v40 = vadd.f32 %v879_v18, %v851_v46 }
 0x106   :  { %v874_v21 = vpop.f32.mrf.mxu2  ;;  %v837_v34 = vpop.f32.mrf.mxu0 }
 0x107   :  { %v838_v35 = vadd.f32 %v837_v34, %v809_v32  ;;  %v3760_v38 = vadd.f32 %v874_v21, %v846_v55 }
 0x108   :  { %v852_v37 = vpop.f32.mrf.mxu1 }
 0x109   :  { %v3744_v30 = vadd.f32 %v866_v59, %v838_v35  ;;  %v853_v47 = vadd.f32 %v852_v37, %v824_v44 }
 0x10b   :  { %v884_v41 = vpack.c.bf16 %v3744_v30, %v3742_v42 }
 0x10c   :  { %v881_v39 = vpop.f32.mrf.mxu3 }
 0x10d   :  { %v3751_v48 = vadd.f32 %v881_v39, %v853_v47  ;;  %912 = vrot.lane.b32.xlu1 %v884_v41, %s3262_s1 }
 0x10e   :  { %v876_v50 = vpop.f32.mrf.mxu2 }
 0x10f   :  { %v887_v49 = vpack.c.bf16 %v3751_v48, %v3749_v40  ;;  %v3758_v57 = vadd.f32 %v876_v50, %v848_v53 }
 0x111   :  { %918 = vrot.lane.b32.xlu0 %v887_v49, %s3262_s1  ;;  %v886_v54 = vpack.c.bf16 %v3758_v57, %v3760_v38 }
 0x119   :  { %916 = vrot.lane.b32.xlu0 %v886_v54, %s3262_s1 }
 0x175   :  { %v915_v58 = vpop.permute.xlu1 %914 }
 0x17f   :  { %v913_v52 = vpop.permute.xlu1 %912 }
 0x183   :  { %v919_v56 = vpop.permute.xlu0 %918 }
 0x184   :  { %941 = vmatpush.bf16.msrb.mxu3 %v919_v56 }
 0x18b   :  { %v917_v59 = vpop.permute.xlu0 %916 }
 0x18c   :  { %942 = vmatpush.bf16.msrb.mxu3 %v917_v59 }
 0x190   :  { %943 = vmatpush.bf16.msrb.mxu3 %v915_v58 }
 0x194   :  { %944 = vmatpush.bf16.msrb.mxu3 %v913_v52 }
 0x197   :  { %2897 = vmatmul.msk.bf16.vlgmr.msrb.gmra.mxu3 %vm924_vm0, %v3768_v60 }
 0x1a7   :  { %2898 = vmatmul.msk.bf16.gmra.mxu3 %vm924_vm0, %v3775_v61 }
 0x1b7   :  { %2899 = vmatmul.msk.bf16.gmra.mxu3 %vm924_vm0, %v3782_v62 }
 0x1c7   :  { %2900 = vmatmul.msk.bf16.gmra.mxu3 %vm924_vm0, %v3789_v63 }
 0x21a   :  { %v946_v0 = vpop.f32.mrf.mxu3 }
 0x21b   :  { %v1015_v23 = vadd.f32 %v946_v0, %v3742_v42 }
 0x222   :  { %v3793_v1 = vpop.f32.mrf.mxu3 }
 0x223   :  { %v966_v2 = vpack.c.bf16 %v3793_v1, %v946_v0 }
 0x225   :  { %974 = vrot.lane.b32.xlu1 %v966_v2, %s3262_s1 }
 0x22a   :  { %v951_v3 = vpop.f32.mrf.mxu3 }
 0x22b   :  { %v1017_v50 = vadd.f32 %v951_v3, %v3734_v13 }
 0x22d   :  { %1055 = vrot.lane.b32.xlu1 %v3760_v38, %s3263_s16 }
 0x232   :  { %v953_v4 = vpop.f32.mrf.mxu3 }
 0x233   :  { %v967_v5 = vpack.c.bf16 %v953_v4, %v951_v3  ;;  %v1018_v41 = vadd.f32 %v953_v4, %v3736_v14 }
 0x235   :  { %1053 = vrot.lane.b32.xlu1 %v3736_v14, %s3263_s16  ;;  %976 = vrot.lane.b32.xlu0 %v967_v5, %s3262_s1 }
 0x23a   :  { %v956_v6 = vpop.f32.mrf.mxu3 }
 0x23d   :  { %1061 = vrot.lane.b32.xlu0 %v3751_v48, %s3263_s16 }
 0x242   :  { %v958_v7 = vpop.f32.mrf.mxu3 }
 0x243   :  { %v968_v11 = vpack.c.bf16 %v958_v7, %v956_v6  ;;  %v1020_v35 = vadd.f32 %v958_v7, %v3758_v57 }
 0x245   :  { %1051 = vrot.lane.b32.xlu0 %v3734_v13, %s3263_s16 }
 0x24a   :  { %v961_v8 = vpop.f32.mrf.mxu3 }
 0x24b   :  { %v1021_v36 = vadd.f32 %v961_v8, %v3749_v40 }
 0x24d   :  { %1049 = vrot.lane.b32.xlu0 %v3744_v30, %s3263_s16 }
 0x252   :  { %v963_v9 = vpop.f32.mrf.mxu3 }
 0x253   :  { %v969_v10 = vpack.c.bf16 %v963_v9, %v961_v8 }
 0x255   :  { %980 = vrot.lane.b32.xlu2 %v969_v10, %s3262_s1 }
 0x25d   :  { %978 = vrot.lane.b32.xlu2 %v968_v11, %s3262_s1 }
 0x265   :  { %1059 = vrot.lane.b32.xlu2 %v3749_v40, %s3263_s16  ;;  %v3221_v40 = vld [vmem:[%s4348_s3] ss:$0 sm:$0xff]  ;;  %s3264_s3 = smov 16  }
 0x26d   :  { %1057 = vrot.lane.b32.xlu2 %v3758_v57, %s3263_s16  ;;  %v1016_v57 = vadd.f32 %v3793_v1, %v3744_v30 }
 0x275   :  { %1047 = vrot.lane.b32.xlu2 %v3742_v42, %s3263_s16  ;;  %v1019_v42 = vadd.f32 %v956_v6, %v3760_v38  ;;  %v1022_v38 = vadd.f32 %v963_v9, %v3751_v48 }
 0x297   :  { %v975_v17 = vpop.permute.xlu1 %974 }
 0x29f   :  { %v1056_v21 = vpop.permute.xlu1 %1055 }
 0x2a7   :  { %v977_v16 = vpop.permute.xlu0 %976  ;;  %v1054_v52 = vpop.permute.xlu1 %1053 }
 0x2af   :  { %v981_v12 = vpop.permute.xlu2 %980  ;;  %v1062_v31 = vpop.permute.xlu0 %1061 }
 0x2b0   :  { %990 = vmatpush.bf16.msrb.mxu0 %v981_v12 }
 0x2b7   :  { %v979_v15 = vpop.permute.xlu2 %978  ;;  %v1052_v47 = vpop.permute.xlu0 %1051 }
 0x2b8   :  { %991 = vmatpush.bf16.msrb.mxu0 %v979_v15 }
 0x2bc   :  { %992 = vmatpush.bf16.msrb.mxu0 %v977_v16 }
 0x2bf   :  { %v1060_v32 = vpop.permute.xlu2 %1059  ;;  %v1050_v8 = vpop.permute.xlu0 %1049 }
 0x2c0   :  { %993 = vmatpush.bf16.msrb.mxu0 %v975_v17 }
 0x2c3   :  { %2901 = vmatmul.msk.bf16.vlgmr.msrb.gmra.mxu0 %vm924_vm0, %v3768_v60 }
 0x2c7   :  { %v1058_v39 = vpop.permute.xlu2 %1057 }
 0x2cf   :  { %v1048_v10 = vpop.permute.xlu2 %1047 }
 0x2d3   :  { %2902 = vmatmul.msk.bf16.gmra.mxu0 %vm924_vm0, %v3775_v61 }
 0x2e3   :  { %2903 = vmatmul.msk.bf16.gmra.mxu0 %vm924_vm0, %v3782_v62 }
 0x2f3   :  { %2904 = vmatmul.msk.bf16.gmra.mxu0 %vm924_vm0, %v3789_v63 }
 0x340   :  { %v995_v22 = vpop.f32.mrf.mxu0 }
 0x341   :  { %v1023_v24 = vmul.f32 2.0, %v995_v22 }
 0x343   :  { %v1031_v26 = vadd.f32 %v1023_v24, %v1015_v23 }
 0x345   :  { %v1071_v9 = vsub.f32 %v1031_v26, %v1048_v10 }
 0x348   :  { %v997_v27 = vpop.f32.mrf.mxu0 }
 0x349   :  { %v1024_v51 = vmul.f32 2.0, %v997_v27 }
 0x34b   :  { %v1032_v0 = vadd.f32 %v1024_v51, %v1016_v57 }
 0x34d   :  { %v1072_v11 = vsub.f32 %v1032_v0, %v1050_v8 }
 0x34f   :  { %v1083_v22 = vadd.f32 %v3221_v40, %v1072_v11 }
 0x350   :  { %v1000_v28 = vpop.f32.mrf.mxu0 }
 0x351   :  { %v1025_v20 = vmul.f32 2.0, %v1000_v28  ;;  %v1082_v28 = vadd.f32 %v3221_v40, %v1071_v9  ;;  %v1091_v26 = vmax.f32 %v1083_v22, 0.0 }
 0x353   :  { %v1033_v14 = vadd.f32 %v1025_v20, %v1017_v50 }
 0x355   :  { %v1073_v4 = vsub.f32 %v1033_v14, %v1052_v47 }
 0x357   :  { %v1084_v12 = vadd.f32 %v3221_v40, %v1073_v4 }
 0x358   :  { %v1002_v18 = vpop.f32.mrf.mxu0 }
 0x359   :  { %v1026_v44 = vmul.f32 2.0, %v1002_v18  ;;  %v1092_v18 = vmax.f32 %v1084_v12, 0.0 }
 0x35b   :  { %v1034_v53 = vadd.f32 %v1026_v44, %v1018_v41 }
 0x35d   :  { %v1074_v13 = vsub.f32 %v1034_v53, %v1054_v52 }
 0x35f   :  { %v1085_v30 = vadd.f32 %v3221_v40, %v1074_v13 }
 0x360   :  { %v1005_v19 = vpop.f32.mrf.mxu0 }
 0x361   :  { %v1027_v37 = vmul.f32 2.0, %v1005_v19  ;;  %v1093_v23 = vmax.f32 %v1085_v30, 0.0 }
 0x363   :  { %v1035_v43 = vadd.f32 %v1027_v37, %v1019_v42  ;;  %v1099_v42 = vpack.c.bf16 %v1091_v26, %v1091_v26 }
 0x365   :  { %v1075_v56 = vsub.f32 %v1035_v43, %v1056_v21  ;;  %v3841_v21 = vpack.c.bf16 %v1093_v23, %v1093_v23  ;;  %v1122_v47 = vunpack.c.l.b16 %v1099_v42  ;;  %v1236_v22 = vunpack.c.l.bf16 %v1099_v42 }
 0x367   :  { %v1086_v5 = vadd.f32 %v3221_v40, %v1075_v56 }
 0x368   :  { %v1007_v29 = vpop.f32.mrf.mxu0 }
 0x369   :  { %v1028_v33 = vmul.f32 2.0, %v1007_v29  ;;  %v1094_v15 = vmax.f32 %v1086_v5, 0.0 }
 0x36b   :  { %v1036_v45 = vadd.f32 %v1028_v33, %v1020_v35  ;;  %v3834_v19 = vpack.c.bf16 %v1094_v15, %v1094_v15  ;;  %v3843_v35 = vpack.c.bf16 %v1092_v18, %v1092_v18 }
 0x36d   :  { %v1076_v55 = vsub.f32 %v1036_v45, %v1058_v39  ;;  %v1123_v45 = vunpack.c.l.b16 %v3843_v35 }
 0x36f   :  { %v1087_v2 = vadd.f32 %v3221_v40, %v1076_v55 }
 0x370   :  { %v1010_v34 = vpop.f32.mrf.mxu0 }
 0x371   :  { %v1029_v25 = vmul.f32 2.0, %v1010_v34  ;;  %v1095_v1 = vmax.f32 %v1087_v2, 0.0  ;;  %v1090_v34 = vmax.f32 %v1082_v28, 0.0 }
 0x373   :  { %v1037_v46 = vadd.f32 %v1029_v25, %v1021_v36  ;;  %v3832_v27 = vpack.c.bf16 %v1095_v1, %v1095_v1  ;;  %v1125_v36 = vunpack.c.l.b16 %v3834_v19  ;;  %v1124_v25 = vunpack.c.l.b16 %v3841_v21 }
 0x374   :  { %v1098_v44 = vpack.c.bf16 %v1090_v34, %v1090_v34 }
 0x375   :  { %v1077_v49 = vsub.f32 %v1037_v46, %v1060_v32  ;;  %v1126_v33 = vunpack.c.l.b16 %v3832_v27  ;;  %v3852_v46 = vpack.c.b16 %v1124_v25, %v1123_v45 }
 0x376   :  { %v1121_v41 = vunpack.c.l.b16 %v1098_v44  ;;  %v1235_v9 = vunpack.c.l.bf16 %v1098_v44 }
 0x377   :  { %v1088_v58 = vadd.f32 %v3221_v40, %v1077_v49  ;;  %v3847_v37 = vpack.c.b16 %v1126_v33, %v1125_v36  ;;  %v1237_v36 = vunpack.c.l.bf16 %v3843_v35  ;;  %v3163_v35 = vld [vmem:[%s4349_s4 + $0x10] sm:$0xff] }
 0x378   :  { %v1012_v54 = vpop.f32.mrf.mxu0  ;;  %v3855_v39 = vpack.c.b16 %v1122_v47, %v1121_v41  ;;  %v1238_v47 = vunpack.c.l.bf16 %v3841_v21  ;;  %1352 = vmatpush.bf16.msra.mxu3 %v3163_v35  ;;  %v3162_v21 = vld [vmem:[%s4349_s4 + $0x8] sm:$0xff] }
 0x379   :  { %v1030_v59 = vmul.f32 2.0, %v1012_v54  ;;  %v1096_v6 = vmax.f32 %v1088_v58, 0.0 }
 0x37b   :  { %v1038_v3 = vadd.f32 %v1030_v59, %v1022_v38  ;;  %v3828_v16 = vpack.c.bf16 %v1096_v6, %v1096_v6 }
 0x37c   :  { %1353 = vmatpush.bf16.msra.mxu3 %v3162_v21 }
 0x37d   :  { %v1078_v7 = vsub.f32 %v1038_v3, %v1062_v31  ;;  %v1127_v29 = vunpack.c.l.b16 %v3828_v16 }
 0x37f   :  { %v1089_v48 = vadd.f32 %v3221_v40, %v1078_v7 }
 0x381   :  { %v1097_v17 = vmax.f32 %v1089_v48, 0.0 }
 0x383   :  { %v3830_v24 = vpack.c.bf16 %v1097_v17, %v1097_v17 }
 0x385   :  { %v1128_v31 = vunpack.c.l.b16 %v3830_v24 }
 0x387   :  { %v3838_v32 = vpack.c.b16 %v1128_v31, %v1127_v29 }
 0x389   :  { %1141 = vmatpush.bf16.msra.mxu1 %v3838_v32 }
 0x38d   :  { %1142 = vmatpush.bf16.msra.mxu1 %v3847_v37 }
 0x391   :  { %1143 = vmatpush.bf16.msra.mxu1 %v3852_v46 }
 0x395   :  { %1144 = vmatpush.bf16.msra.mxu1 %v3855_v39 }
 0x398   :  { %2905 = vmatmul.msk.bf16.vlgmr.msra.gmra.mxu1 %vm924_vm0, %v3768_v60 }
 0x3a8   :  { %2906 = vmatmul.msk.bf16.gmra.mxu1 %vm924_vm0, %v3775_v61 }
 0x3b8   :  { %2907 = vmatmul.msk.bf16.gmra.mxu1 %vm924_vm0, %v3782_v62 }
 0x3c8   :  { %2908 = vmatmul.msk.bf16.gmra.mxu1 %vm924_vm0, %v3789_v63 }
 0x415   :  { %v1146_v20 = vpop.f32.mrf.mxu1 }
 0x416   :  { %v1166_v43 = vpack.c.bf16 %v1146_v20, %v1146_v20 }
 0x418   :  { %v1182_v40 = vunpack.c.l.b16 %v1166_v43 }
 0x41d   :  { %v1148_v49 = vpop.f32.mrf.mxu1 }
 0x41e   :  { %v1167_v50 = vpack.c.bf16 %v1148_v49, %v1148_v49 }
 0x420   :  { %v1183_v51 = vunpack.c.l.b16 %v1167_v50 }
 0x422   :  { %v1190_v53 = vpack.c.b16 %v1183_v51, %v1182_v40 }
 0x424   :  { %1259 = vrot.lane.b32.xlu1 %v1190_v53, %s3264_s3 }
 0x425   :  { %v1151_v55 = vpop.f32.mrf.mxu1 }
 0x426   :  { %v1168_v57 = vpack.c.bf16 %v1151_v55, %v1151_v55 }
 0x428   :  { %v1184_v14 = vunpack.c.l.b16 %v1168_v57 }
 0x42d   :  { %v1153_v38 = vpop.f32.mrf.mxu1 }
 0x42e   :  { %v1169_v54 = vpack.c.bf16 %v1153_v38, %v1153_v38 }
 0x430   :  { %v1185_v56 = vunpack.c.l.b16 %v1169_v54  ;;  %v1240_v54 = vunpack.c.l.bf16 %v3832_v27  ;;  %v1241_v27 = vunpack.c.l.bf16 %v3828_v16 }
 0x432   :  { %v1191_v58 = vpack.c.b16 %v1185_v56, %v1184_v14  ;;  %v3161_v14 = vld [vmem:[%s4349_s4] sm:$0xff] }
 0x433   :  { %1354 = vmatpush.bf16.msra.mxu3 %v3161_v14 }
 0x434   :  { %1261 = vrot.lane.b32.xlu0 %v1191_v58, %s3264_s3 }
 0x435   :  { %v1156_v59 = vpop.f32.mrf.mxu1 }
 0x436   :  { %v1170_v5 = vpack.c.bf16 %v1156_v59, %v1156_v59 }
 0x438   :  { %v1186_v11 = vunpack.c.l.b16 %v1170_v5 }
 0x43d   :  { %v1158_v52 = vpop.f32.mrf.mxu1 }
 0x43e   :  { %v1171_v3 = vpack.c.bf16 %v1158_v52, %v1158_v52 }
 0x440   :  { %v1187_v8 = vunpack.c.l.b16 %v1171_v3 }
 0x442   :  { %v1192_v30 = vpack.c.b16 %v1187_v8, %v1186_v11 }
 0x445   :  { %v1161_v0 = vpop.f32.mrf.mxu1 }
 0x446   :  { %v1172_v13 = vpack.c.bf16 %v1161_v0, %v1161_v0 }
 0x448   :  { %v1188_v6 = vunpack.c.l.b16 %v1172_v13 }
 0x44d   :  { %v1163_v2 = vpop.f32.mrf.mxu1 }
 0x44e   :  { %v1173_v4 = vpack.c.bf16 %v1163_v2, %v1163_v2 }
 0x450   :  { %v1189_v7 = vunpack.c.l.b16 %v1173_v4 }
 0x452   :  { %v1193_v10 = vpack.c.b16 %v1189_v7, %v1188_v6  ;;  %v1242_v6 = vunpack.c.l.bf16 %v3830_v24 }
 0x454   :  { %1202 = vmatpush.bf16.msra.mxu2 %v1193_v10 }
 0x458   :  { %1203 = vmatpush.bf16.msra.mxu2 %v1192_v30 }
 0x45c   :  { %1204 = vmatpush.bf16.msra.mxu2 %v1191_v58 }
 0x460   :  { %1205 = vmatpush.bf16.msra.mxu2 %v1190_v53  ;;  %v1239_v53 = vunpack.c.l.bf16 %v3834_v19 }
 0x463   :  { %2909 = vmatmul.msk.bf16.vlgmr.msra.gmra.mxu2 %vm924_vm0, %v3768_v60 }
 0x473   :  { %2910 = vmatmul.msk.bf16.gmra.mxu2 %vm924_vm0, %v3775_v61 }
 0x483   :  { %2911 = vmatmul.msk.bf16.gmra.mxu2 %vm924_vm0, %v3782_v62 }
 0x493   :  { %2912 = vmatmul.msk.bf16.gmra.mxu2 %vm924_vm0, %v3789_v63 }
 0x4a6   :  { %v1262_v24 = vpop.permute.xlu0 %1261 }
 0x4e6   :  { %v1207_v1 = vpop.f32.mrf.mxu2 }
 0x4e7   :  { %v1227_v48 = vmul.f32 2.0, %v1207_v1 }
 0x4e9   :  { %v1243_v12 = vsub.f32 %v1227_v48, %v1235_v9  ;;  %v1260_v48 = vpop.permute.xlu1 %1259 }
 0x4ea   :  { %v1298_v16 = vsel %vm1295_vm1, %v3855_v39, %v1260_v48 }
 0x4eb   :  { %v1251_v23 = vpack.c.bf16 %v1243_v12, %v1243_v12 }
 0x4ed   :  { %v1275_v29 = vunpack.c.l.b16 %v1251_v23 }
 0x4ee   :  { %v1209_v15 = vpop.f32.mrf.mxu2 }
 0x4ef   :  { %v1228_v17 = vmul.f32 2.0, %v1209_v15  ;;  %v1301_v15 = vsel %vm1295_vm1, %v3852_v46, %v1262_v24 }
 0x4f1   :  { %v1244_v28 = vsub.f32 %v1228_v17, %v1236_v22 }
 0x4f3   :  { %v1252_v18 = vpack.c.bf16 %v1244_v28, %v1244_v28 }
 0x4f5   :  { %v1276_v31 = vunpack.c.l.b16 %v1252_v18 }
 0x4f6   :  { %v1212_v26 = vpop.f32.mrf.mxu2 }
 0x4f7   :  { %v1283_v33 = vpack.c.b16 %v1276_v31, %v1275_v29  ;;  %v1229_v34 = vmul.f32 2.0, %v1212_v26 }
 0x4f9   :  { %1287 = vrot.lane.b32.xlu2 %v1283_v33, %s3265_s19  ;;  %v1245_v25 = vsub.f32 %v1229_v34, %v1237_v36 }
 0x4fb   :  { %v1253_v41 = vpack.c.bf16 %v1245_v25, %v1245_v25 }
 0x4fd   :  { %v1277_v43 = vunpack.c.l.b16 %v1253_v41 }
 0x4fe   :  { %v1214_v45 = vpop.f32.mrf.mxu2 }
 0x4ff   :  { %v1230_v44 = vmul.f32 2.0, %v1214_v45 }
 0x501   :  { %v1246_v42 = vsub.f32 %v1230_v44, %v1238_v47  ;;  %1263 = vrot.lane.b32.xlu2 %v1192_v30, %s3264_s3  ;;  %v3222_v47 = vld [vmem:[%s4350_s5] ss:$0 sm:$0xff]  ;;  %s3266_s5 = smov 64  }
 0x503   :  { %v1254_v20 = vpack.c.bf16 %v1246_v42, %v1246_v42 }
 0x505   :  { %v1278_v49 = vunpack.c.l.b16 %v1254_v20 }
 0x506   :  { %v1217_v50 = vpop.f32.mrf.mxu2 }
 0x507   :  { %v1284_v40 = vpack.c.b16 %v1278_v49, %v1277_v43  ;;  %v1231_v51 = vmul.f32 2.0, %v1217_v50 }
 0x509   :  { %1289 = vrot.lane.b32.xlu1 %v1284_v40, %s3265_s19  ;;  %v1247_v55 = vsub.f32 %v1231_v51, %v1239_v53 }
 0x50b   :  { %v1255_v56 = vpack.c.bf16 %v1247_v55, %v1247_v55 }
 0x50d   :  { %v1279_v59 = vunpack.c.l.b16 %v1255_v56 }
 0x50e   :  { %v1219_v57 = vpop.f32.mrf.mxu2 }
 0x50f   :  { %v1232_v38 = vmul.f32 2.0, %v1219_v57 }
 0x511   :  { %v1248_v58 = vsub.f32 %v1232_v38, %v1240_v54  ;;  %1265 = vrot.lane.b32.xlu1 %v1193_v10, %s3264_s3 }
 0x513   :  { %v1256_v19 = vpack.c.bf16 %v1248_v58, %v1248_v58 }
 0x515   :  { %v1280_v52 = vunpack.c.l.b16 %v1256_v19 }
 0x516   :  { %v1222_v0 = vpop.f32.mrf.mxu2 }
 0x517   :  { %v1285_v13 = vpack.c.b16 %v1280_v52, %v1279_v59  ;;  %v1233_v2 = vmul.f32 2.0, %v1222_v0 }
 0x519   :  { %1291 = vrot.lane.b32.xlu0 %v1285_v13, %s3265_s19  ;;  %v1249_v3 = vsub.f32 %v1233_v2, %v1241_v27 }
 0x51b   :  { %v1257_v7 = vpack.c.bf16 %v1249_v3, %v1249_v3 }
 0x51d   :  { %v1281_v10 = vunpack.c.l.b16 %v1257_v7 }
 0x51e   :  { %v1224_v4 = vpop.f32.mrf.mxu2 }
 0x51f   :  { %v1234_v5 = vmul.f32 2.0, %v1224_v4 }
 0x521   :  { %v1250_v8 = vsub.f32 %v1234_v5, %v1242_v6 }
 0x523   :  { %v1258_v11 = vpack.c.bf16 %v1250_v8, %v1250_v8 }
 0x525   :  { %v1282_v30 = vunpack.c.l.b16 %v1258_v11 }
 0x527   :  { %v1286_v1 = vpack.c.b16 %v1282_v30, %v1281_v10 }
 0x529   :  { %1293 = vrot.lane.b32.xlu2 %v1286_v1, %s3265_s19 }
 0x553   :  { %v1288_v9 = vpop.permute.xlu2 %1287 }
 0x554   :  { %v1310_v12 = vsel %vm1308_vm2, %v1298_v16, %v1288_v9 }
 0x555   :  { %2925 = vmatmul.msk.bf16.vlgmr.msra.gmra.mxu3 %vm1338_vm3, %v1310_v12 }
 0x55b   :  { %v1264_v23 = vpop.permute.xlu2 %1263 }
 0x55c   :  { %v1304_v28 = vsel %vm1295_vm1, %v3847_v37, %v1264_v23 }
 0x57b   :  { %v1290_v17 = vpop.permute.xlu1 %1289 }
 0x57c   :  { %v1312_v22 = vsel %vm1308_vm2, %v1301_v15, %v1290_v17 }
 0x57d   :  { %2926 = vmatmul.msk.bf16.gmra.mxu3 %vm1338_vm3, %v1312_v22 }
 0x583   :  { %v1266_v29 = vpop.permute.xlu1 %1265  ;;  %v1294_v26 = vpop.permute.xlu2 %1293 }
 0x584   :  { %v1307_v31 = vsel %vm1295_vm1, %v3838_v32, %v1266_v29 }
 0x585   :  { %v1316_v46 = vsel %vm1308_vm2, %v1307_v31, %v1294_v26 }
 0x58b   :  { %v1292_v18 = vpop.permute.xlu0 %1291 }
 0x58c   :  { %v1314_v39 = vsel %vm1308_vm2, %v1304_v28, %v1292_v18 }
 0x58d   :  { %2927 = vmatmul.msk.bf16.gmra.mxu3 %vm1338_vm3, %v1314_v39 }
 0x59d   :  { %2928 = vmatmul.msk.bf16.gmra.mxu3 %vm1338_vm3, %v1316_v46 }
 0x5d8   :  { %v1356_v33 = vpop.f32.mrf.mxu3 }
 0x5d9   :  { %v1357_v14 = vadd.f32 %v3222_v47, %v1356_v33 }
 0x5db   :  { %v1376_v27 = vmax.f32 %v1357_v14, 0.0 }
 0x5dd   :  { %v1384_v8 = vpack.c.bf16 %v1376_v27, %v1376_v27 }
 0x5df   :  { %v1413_v1 = vunpack.c.l.b16 %v1384_v8 }
 0x5e0   :  { %v1358_v34 = vpop.f32.mrf.mxu3 }
 0x5e1   :  { %v1359_v55 = vadd.f32 %v3222_v47, %v1358_v34 }
 0x5e3   :  { %v1377_v52 = vmax.f32 %v1359_v55, 0.0 }
 0x5e5   :  { %v3935_v5 = vpack.c.bf16 %v1377_v52, %v1377_v52 }
 0x5e7   :  { %v1414_v10 = vunpack.c.l.b16 %v3935_v5 }
 0x5e9   :  { %v3946_v48 = vpack.c.b16 %v1414_v10, %v1413_v1 }
 0x600   :  { %v1361_v36 = vpop.f32.mrf.mxu3 }
 0x601   :  { %v1362_v51 = vadd.f32 %v3222_v47, %v1361_v36 }
 0x603   :  { %v1378_v56 = vmax.f32 %v1362_v51, 0.0 }
 0x605   :  { %v3931_v3 = vpack.c.bf16 %v1378_v56, %v1378_v56 }
 0x607   :  { %v1415_v11 = vunpack.c.l.b16 %v3931_v3 }
 0x608   :  { %v1363_v25 = vpop.f32.mrf.mxu3 }
 0x609   :  { %v1364_v49 = vadd.f32 %v3222_v47, %v1363_v25 }
 0x60b   :  { %v1379_v57 = vmax.f32 %v1364_v49, 0.0 }
 0x60d   :  { %v3926_v0 = vpack.c.bf16 %v1379_v57, %v1379_v57 }
 0x60f   :  { %v1416_v6 = vunpack.c.l.b16 %v3926_v0  ;;  %v1530_v27 = vunpack.c.l.bf16 %v3926_v0  ;;  %v3168_v0 = vld [vmem:[%s4351_s6 + $0x20] sm:$0xff] }
 0x610   :  { %v1366_v45 = vpop.f32.mrf.mxu3 }
 0x611   :  { %v1367_v20 = vadd.f32 %v3222_v47, %v1366_v45  ;;  %v3943_v30 = vpack.c.b16 %v1416_v6, %v1415_v11 }
 0x613   :  { %v1380_v35 = vmax.f32 %v1367_v20, 0.0 }
 0x615   :  { %v3922_v58 = vpack.c.bf16 %v1380_v35, %v1380_v35 }
 0x617   :  { %v1417_v4 = vunpack.c.l.b16 %v3922_v58 }
 0x618   :  { %v1368_v37 = vpop.f32.mrf.mxu3 }
 0x619   :  { %v1369_v42 = vadd.f32 %v3222_v47, %v1368_v37 }
 0x61b   :  { %v1381_v50 = vmax.f32 %v1369_v42, 0.0 }
 0x61d   :  { %v3918_v38 = vpack.c.bf16 %v1381_v50, %v1381_v50 }
 0x61f   :  { %v1418_v13 = vunpack.c.l.b16 %v3918_v38 }
 0x620   :  { %v1371_v44 = vpop.f32.mrf.mxu3 }
 0x621   :  { %v1372_v41 = vadd.f32 %v3222_v47, %v1371_v44  ;;  %v3938_v7 = vpack.c.b16 %v1418_v13, %v1417_v4 }
 0x623   :  { %v1382_v32 = vmax.f32 %v1372_v41, 0.0 }
 0x625   :  { %v3916_v53 = vpack.c.bf16 %v1382_v32, %v1382_v32 }
 0x627   :  { %v1419_v19 = vunpack.c.l.b16 %v3916_v53 }
 0x628   :  { %v1373_v43 = vpop.f32.mrf.mxu3 }
 0x629   :  { %v1374_v40 = vadd.f32 %v3222_v47, %v1373_v43 }
 0x62b   :  { %v1383_v21 = vmax.f32 %v1374_v40, 0.0  ;;  %v1527_v40 = vunpack.c.l.bf16 %v1384_v8 }
 0x62d   :  { %v3920_v54 = vpack.c.bf16 %v1383_v21, %v1383_v21  ;;  %v1528_v21 = vunpack.c.l.bf16 %v3935_v5 }
 0x62f   :  { %v1420_v59 = vunpack.c.l.b16 %v3920_v54 }
 0x631   :  { %v3929_v2 = vpack.c.b16 %v1420_v59, %v1419_v19 }
 0x633   :  { %1433 = vmatpush.bf16.msra.mxu0 %v3929_v2 }
 0x637   :  { %1434 = vmatpush.bf16.msra.mxu0 %v3938_v7 }
 0x63b   :  { %1435 = vmatpush.bf16.msra.mxu0 %v3943_v30 }
 0x63f   :  { %1436 = vmatpush.bf16.msra.mxu0 %v3946_v48 }
 0x642   :  { %2929 = vmatmul.msk.bf16.vlgmr.msra.gmra.mxu0 %vm924_vm0, %v3768_v60 }
 0x652   :  { %2930 = vmatmul.msk.bf16.gmra.mxu0 %vm924_vm0, %v3775_v61 }
 0x662   :  { %2931 = vmatmul.msk.bf16.gmra.mxu0 %vm924_vm0, %v3782_v62 }
 0x672   :  { %2932 = vmatmul.msk.bf16.gmra.mxu0 %vm924_vm0, %v3789_v63 }
 0x6bf   :  { %v1438_v16 = vpop.f32.mrf.mxu0 }
 0x6c0   :  { %v1458_v9 = vpack.c.bf16 %v1438_v16, %v1438_v16 }
 0x6c2   :  { %v1474_v15 = vunpack.c.l.b16 %v1458_v9 }
 0x6c7   :  { %v1440_v12 = vpop.f32.mrf.mxu0 }
 0x6c8   :  { %v1459_v24 = vpack.c.bf16 %v1440_v12, %v1440_v12  ;;  %v1531_v12 = vunpack.c.l.bf16 %v3922_v58 }
 0x6ca   :  { %v1475_v17 = vunpack.c.l.b16 %v1459_v24 }
 0x6cc   :  { %v1482_v22 = vpack.c.b16 %v1475_v17, %v1474_v15  ;;  %v1532_v17 = vunpack.c.l.bf16 %v3918_v38 }
 0x6ce   :  { %1551 = vrot.lane.b32.xlu0 %v1482_v22, %s3265_s19 }
 0x6cf   :  { %v1443_v23 = vpop.f32.mrf.mxu0 }
 0x6d0   :  { %v1460_v28 = vpack.c.bf16 %v1443_v23, %v1443_v23  ;;  %v3167_v23 = vld [vmem:[%s4351_s6 + $0x18] sm:$0xff] }
 0x6d2   :  { %v1476_v29 = vunpack.c.l.b16 %v1460_v28 }
 0x6d7   :  { %v1445_v18 = vpop.f32.mrf.mxu0 }
 0x6d8   :  { %v1461_v39 = vpack.c.bf16 %v1445_v18, %v1445_v18 }
 0x6da   :  { %v1477_v31 = vunpack.c.l.b16 %v1461_v39  ;;  %v3166_v39 = vld [vmem:[%s4351_s6 + $0x10] sm:$0xff] }
 0x6dc   :  { %v1483_v26 = vpack.c.b16 %v1477_v31, %v1476_v29 }
 0x6de   :  { %1553 = vrot.lane.b32.xlu2 %v1483_v26, %s3265_s19 }
 0x6df   :  { %v1448_v46 = vpop.f32.mrf.mxu0 }
 0x6e0   :  { %v1462_v44 = vpack.c.bf16 %v1448_v46, %v1448_v46  ;;  %v3165_v46 = vld [vmem:[%s4351_s6 + $0x8] sm:$0xff] }
 0x6e2   :  { %v1478_v32 = vunpack.c.l.b16 %v1462_v44 }
 0x6e7   :  { %v1450_v33 = vpop.f32.mrf.mxu0 }
 0x6e8   :  { %v1463_v45 = vpack.c.bf16 %v1450_v33, %v1450_v33 }
 0x6ea   :  { %v1479_v42 = vunpack.c.l.b16 %v1463_v45 }
 0x6ec   :  { %v1484_v43 = vpack.c.b16 %v1479_v42, %v1478_v32 }
 0x6ef   :  { %v1453_v34 = vpop.f32.mrf.mxu0 }
 0x6f0   :  { %v1464_v36 = vpack.c.bf16 %v1453_v34, %v1453_v34  ;;  %v1533_v34 = vunpack.c.l.bf16 %v3916_v53 }
 0x6f2   :  { %v1480_v47 = vunpack.c.l.b16 %v1464_v36  ;;  %v3164_v36 = vld [vmem:[%s4351_s6] sm:$0xff] }
 0x6f7   :  { %v1455_v25 = vpop.f32.mrf.mxu0 }
 0x6f8   :  { %v1465_v37 = vpack.c.bf16 %v1455_v25, %v1455_v25 }
 0x6fa   :  { %v1481_v41 = vunpack.c.l.b16 %v1465_v37  ;;  %v1534_v37 = vunpack.c.l.bf16 %v3920_v54 }
 0x6fc   :  { %v1485_v20 = vpack.c.b16 %v1481_v41, %v1480_v47 }
 0x6fe   :  { %1494 = vmatpush.bf16.msrb.mxu1 %v1485_v20 }
 0x702   :  { %1495 = vmatpush.bf16.msrb.mxu1 %v1484_v43 }
 0x706   :  { %1496 = vmatpush.bf16.msrb.mxu1 %v1483_v26 }
 0x70a   :  { %1497 = vmatpush.bf16.msrb.mxu1 %v1482_v22 }
 0x70d   :  { %2933 = vmatmul.msk.bf16.vlgmr.msrb.gmra.mxu1 %vm924_vm0, %v3768_v60 }
 0x71d   :  { %2934 = vmatmul.msk.bf16.gmra.mxu1 %vm924_vm0, %v3775_v61 }
 0x72d   :  { %2935 = vmatmul.msk.bf16.gmra.mxu1 %vm924_vm0, %v3782_v62  ;;  %v1529_v62 = vunpack.c.l.bf16 %v3931_v3  ;;  %v3169_v3 = vld [vmem:[%s4351_s6 + $0x28] sm:$0xff] }
 0x72e   :  { %1657 = vmatpush.bf16.msrb.mxu2 %v3169_v3 }
 0x732   :  { %1658 = vmatpush.bf16.msrb.mxu2 %v3168_v0 }
 0x736   :  { %1659 = vmatpush.bf16.msrb.mxu2 %v3167_v23 }
 0x738   :  { %v1554_v54 = vpop.permute.xlu2 %1553 }
 0x73a   :  { %1660 = vmatpush.bf16.msrb.mxu2 %v3166_v39 }
 0x73d   :  { %2936 = vmatmul.msk.bf16.gmra.mxu1 %vm924_vm0, %v3789_v63 }
 0x73e   :  { %1661 = vmatpush.bf16.msrb.mxu2 %v3165_v46 }
 0x740   :  { %v1552_v53 = vpop.permute.xlu0 %1551 }
 0x742   :  { %1662 = vmatpush.bf16.msrb.mxu2 %v3164_v36 }
 0x78a   :  { %v1499_v49 = vpop.f32.mrf.mxu1 }
 0x78b   :  { %v1519_v50 = vmul.f32 2.0, %v1499_v49  ;;  %v1589_v49 = vsel %vm1308_vm2, %v3946_v48, %v1552_v53 }
 0x78d   :  { %v1535_v51 = vsub.f32 %v1519_v50, %v1527_v40 }
 0x78f   :  { %v1543_v57 = vpack.c.bf16 %v1535_v51, %v1535_v51  ;;  %v1592_v51 = vsel %vm1308_vm2, %v3943_v30, %v1554_v54  ;;  %v4081_v54 = vld [vmem:[%s4347_s0 + $0x18] sm:$0xff] }
 0x791   :  { %v1567_v56 = vunpack.c.l.b16 %v1543_v57 }
 0x792   :  { %v1501_v35 = vpop.f32.mrf.mxu1 }
 0x793   :  { %v1520_v55 = vmul.f32 2.0, %v1501_v35 }
 0x795   :  { %v1536_v14 = vsub.f32 %v1520_v55, %v1528_v21 }
 0x797   :  { %v1544_v60 = vpack.c.bf16 %v1536_v14, %v1536_v14 }
 0x799   :  { %v1568_v19 = vunpack.c.l.b16 %v1544_v60 }
 0x79a   :  { %v1504_v61 = vpop.f32.mrf.mxu1 }
 0x79b   :  { %v1575_v59 = vpack.c.b16 %v1568_v19, %v1567_v56  ;;  %v1521_v52 = vmul.f32 2.0, %v1504_v61  ;;  %v3173_v61 = vld [vmem:[%s4353_s8 + $0x18] sm:$0xff] }
 0x79c   :  { %1944 = vmatpush.bf16.msra.mxu2 %v3173_v61 }
 0x79d   :  { %1579 = vrot.lane.b32.xlu1 %v1575_v59, %s3266_s5  ;;  %v1537_v63 = vsub.f32 %v1521_v52, %v1529_v62  ;;  %v3171_v59 = vld [vmem:[%s4353_s8 + $0x8] sm:$0xff]  ;;  %v3223_v52 = vld [vmem:[%s4352_s7] ss:$0 sm:$0xff] }
 0x79f   :  { %v1545_v5 = vpack.c.bf16 %v1537_v63, %v1537_v63 }
 0x7a1   :  { %v1569_v11 = vunpack.c.l.b16 %v1545_v5 }
 0x7a2   :  { %v1506_v13 = vpop.f32.mrf.mxu1 }
 0x7a3   :  { %v1522_v4 = vmul.f32 2.0, %v1506_v13 }
 0x7a5   :  { %v1538_v6 = vsub.f32 %v1522_v4, %v1530_v27  ;;  %1555 = vrot.lane.b32.xlu1 %v1484_v43, %s3265_s19 }
 0x7a7   :  { %v1546_v8 = vpack.c.bf16 %v1538_v6, %v1538_v6 }
 0x7a9   :  { %v1570_v10 = vunpack.c.l.b16 %v1546_v8 }
 0x7aa   :  { %v1509_v1 = vpop.f32.mrf.mxu1 }
 0x7ab   :  { %v1576_v16 = vpack.c.b16 %v1570_v10, %v1569_v11  ;;  %v1523_v9 = vmul.f32 2.0, %v1509_v1 }
 0x7ad   :  { %1581 = vrot.lane.b32.xlu0 %v1576_v16, %s3266_s5  ;;  %v1539_v24 = vsub.f32 %v1523_v9, %v1531_v12 }
 0x7af   :  { %v1547_v28 = vpack.c.bf16 %v1539_v24, %v1539_v24 }
 0x7b1   :  { %v1571_v29 = vunpack.c.l.b16 %v1547_v28 }
 0x7b2   :  { %v1511_v15 = vpop.f32.mrf.mxu1 }
 0x7b3   :  { %v1524_v22 = vmul.f32 2.0, %v1511_v15 }
 0x7b5   :  { %v1540_v18 = vsub.f32 %v1524_v22, %v1532_v17  ;;  %1557 = vrot.lane.b32.xlu0 %v1485_v20, %s3265_s19 }
 0x7b7   :  { %v1548_v58 = vpack.c.bf16 %v1540_v18, %v1540_v18 }
 0x7b9   :  { %v1572_v31 = vunpack.c.l.b16 %v1548_v58 }
 0x7ba   :  { %v1514_v26 = vpop.f32.mrf.mxu1 }
 0x7bb   :  { %v1577_v38 = vpack.c.b16 %v1572_v31, %v1571_v29  ;;  %v1525_v33 = vmul.f32 2.0, %v1514_v26 }
 0x7bd   :  { %1583 = vrot.lane.b32.xlu2 %v1577_v38, %s3266_s5  ;;  %v1541_v25 = vsub.f32 %v1525_v33, %v1533_v34 }
 0x7bf   :  { %v1549_v47 = vpack.c.bf16 %v1541_v25, %v1541_v25 }
 0x7c1   :  { %v1573_v20 = vunpack.c.l.b16 %v1549_v47 }
 0x7c2   :  { %v1516_v45 = vpop.f32.mrf.mxu1 }
 0x7c3   :  { %v1526_v44 = vmul.f32 2.0, %v1516_v45 }
 0x7c5   :  { %v1542_v41 = vsub.f32 %v1526_v44, %v1534_v37 }
 0x7c7   :  { %v1550_v42 = vpack.c.bf16 %v1542_v41, %v1542_v41 }
 0x7c9   :  { %v1574_v32 = vunpack.c.l.b16 %v1550_v42 }
 0x7cb   :  { %v1578_v43 = vpack.c.b16 %v1574_v32, %v1573_v20 }
 0x7cd   :  { %1585 = vrot.lane.b32.xlu1 %v1578_v43, %s3266_s5 }
 0x80f   :  { %v1580_v50 = vpop.permute.xlu1 %1579 }
 0x810   :  { %v1600_v40 = vsel %vm924_vm0, %v1589_v49, %v1580_v50  ;;  %v4060_v49 = vld [vmem:[%s4347_s0] sm:$0xff]  ;;  %v4067_v50 = vld [vmem:[%s4347_s0 + $0x8] sm:$0xff] }
 0x811   :  { %2961 = vmatmul.msk.bf16.vlgmr.msrb.gmra.mxu2 %vm1646_vm4, %v1600_v40  ;;  %v4074_v40 = vld [vmem:[%s4347_s0 + $0x10] sm:$0xff] }
 0x817   :  { %v1556_v55 = vpop.permute.xlu1 %1555  ;;  %v1584_v14 = vpop.permute.xlu2 %1583 }
 0x818   :  { %v1595_v57 = vsel %vm1308_vm2, %v3938_v7, %v1556_v55  ;;  %v3172_v7 = vld [vmem:[%s4353_s8 + $0x10] sm:$0xff]  ;;  %v3174_v55 = vld [vmem:[%s4354_s9] sm:$0xff] }
 0x819   :  { %v1604_v48 = vsel %vm924_vm0, %v1595_v57, %v1584_v14  ;;  %1945 = vmatpush.bf16.msra.mxu2 %v3172_v7 }
 0x81d   :  { %1946 = vmatpush.bf16.msra.mxu2 %v3171_v59 }
 0x81f   :  { %v1582_v35 = vpop.permute.xlu0 %1581 }
 0x820   :  { %v1602_v21 = vsel %vm924_vm0, %v1592_v51, %v1582_v35  ;;  %v3177_v51 = vld [vmem:[%s4354_s9 + $0x18] sm:$0xff]  ;;  %v3176_v35 = vld [vmem:[%s4354_s9 + $0x10] sm:$0xff] }
 0x821   :  { %2962 = vmatmul.msk.bf16.gmra.mxu2 %vm1646_vm4, %v1602_v21  ;;  %1879 = vmatpush.bf16.msra.mxu1 %v3177_v51  ;;  %v3175_v21 = vld [vmem:[%s4354_s9 + $0x8] sm:$0xff] }
 0x825   :  { %1880 = vmatpush.bf16.msra.mxu1 %v3176_v35 }
 0x827   :  { %v1558_v60 = vpop.permute.xlu0 %1557 }
 0x828   :  { %v1598_v56 = vsel %vm1308_vm2, %v3929_v2, %v1558_v60  ;;  %v3170_v2 = vld [vmem:[%s4353_s8] sm:$0xff] }
 0x829   :  { %1947 = vmatpush.bf16.msra.mxu2 %v3170_v2  ;;  %1881 = vmatpush.bf16.msra.mxu1 %v3175_v21  ;;  %v3185_v21 = vld [vmem:[%s4357_s12 + $0x18] sm:$0xff] }
 0x82d   :  { %1882 = vmatpush.bf16.msra.mxu1 %v3174_v55  ;;  %v3184_v55 = vld [vmem:[%s4357_s12 + $0x10] sm:$0xff] }
 0x831   :  { %2963 = vmatmul.msk.bf16.gmra.mxu2 %vm1646_vm4, %v1604_v48 }
 0x83f   :  { %v1586_v19 = vpop.permute.xlu1 %1585 }
 0x840   :  { %v1606_v30 = vsel %vm924_vm0, %v1598_v56, %v1586_v19 }
 0x841   :  { %2964 = vmatmul.msk.bf16.gmra.mxu2 %vm1646_vm4, %v1606_v30 }
 0x894   :  { %v1664_v62 = vpop.f32.mrf.mxu2 }
 0x895   :  { %v1665_v63 = vadd.f32 %v3223_v52, %v1664_v62  ;;  %v3181_v62 = vld [vmem:[%s4356_s10 + $0x18] sm:$0xff] }
 0x897   :  { %v1684_v13 = vmax.f32 %v1665_v63, 0.0  ;;  %v3180_v63 = vld [vmem:[%s4356_s10 + $0x10] sm:$0xff] }
 0x899   :  { %v4029_v5 = vpack.c.bf16 %v1684_v13, %v1684_v13  ;;  %v3179_v13 = vld [vmem:[%s4356_s10 + $0x8] sm:$0xff] }
 0x89b   :  { %v1733_v11 = vunpack.c.l.b16 %v4029_v5 }
 0x89c   :  { %v1666_v27 = vpop.f32.mrf.mxu2 }
 0x89d   :  { %v1667_v4 = vadd.f32 %v3223_v52, %v1666_v27  ;;  %v3178_v27 = vld [vmem:[%s4356_s10] sm:$0xff] }
 0x89f   :  { %v1685_v6 = vmax.f32 %v1667_v4, 0.0 }
 0x8a1   :  { %v4031_v8 = vpack.c.bf16 %v1685_v6, %v1685_v6 }
 0x8a3   :  { %v1734_v10 = vunpack.c.l.b16 %v4031_v8 }
 0x8a4   :  { %v1669_v1 = vpop.f32.mrf.mxu2 }
 0x8a5   :  { %v1741_v16 = vpack.c.b16 %v1734_v10, %v1733_v11  ;;  %v1670_v9 = vadd.f32 %v3223_v52, %v1669_v1  ;;  %v1819_v10 = vunpack.c.l.bf16 %v4029_v5  ;;  %v1820_v1 = vunpack.c.l.bf16 %v4031_v8  ;;  %v3189_v5 = vld [vmem:[%s4357_s12 + $0x38] sm:$0xff] }
 0x8a7   :  { %3009 = vmatmul.msk.bf16.vlgmr.msra.gmra.mxu2 %vm924_vm0, %v1741_v16  ;;  %v1686_v3 = vmax.f32 %v1670_v9, 0.0 }
 0x8a9   :  { %v4036_v24 = vpack.c.bf16 %v1686_v3, %v1686_v3 }
 0x8ab   :  { %v1735_v22 = vunpack.c.l.b16 %v4036_v24 }
 0x8ac   :  { %v1671_v12 = vpop.f32.mrf.mxu2 }
 0x8ad   :  { %v1672_v0 = vadd.f32 %v3223_v52, %v1671_v12 }
 0x8af   :  { %v1687_v15 = vmax.f32 %v1672_v0, 0.0 }
 0x8b1   :  { %v4038_v17 = vpack.c.bf16 %v1687_v15, %v1687_v15 }
 0x8b3   :  { %v1736_v23 = vunpack.c.l.b16 %v4038_v17 }
 0x8b4   :  { %v1674_v28 = vpop.f32.mrf.mxu2 }
 0x8b5   :  { %v1742_v18 = vpack.c.b16 %v1736_v23, %v1735_v22  ;;  %v1675_v58 = vadd.f32 %v3223_v52, %v1674_v28  ;;  %v1821_v23 = vunpack.c.l.bf16 %v4036_v24  ;;  %v1822_v28 = vunpack.c.l.bf16 %v4038_v17  ;;  %v3187_v24 = vld [vmem:[%s4357_s12 + $0x28] sm:$0xff] }
 0x8b7   :  { %3010 = vmatmul.msk.bf16.gmra.mxu2 %vm924_vm0, %v1742_v18  ;;  %v1688_v39 = vmax.f32 %v1675_v58, 0.0 }
 0x8b9   :  { %v4043_v26 = vpack.c.bf16 %v1688_v39, %v1688_v39 }
 0x8bb   :  { %v1737_v33 = vunpack.c.l.b16 %v4043_v26 }
 0x8bc   :  { %v1676_v29 = vpop.f32.mrf.mxu2 }
 0x8bd   :  { %v1677_v31 = vadd.f32 %v3223_v52, %v1676_v29 }
 0x8bf   :  { %v1689_v38 = vmax.f32 %v1677_v31, 0.0  ;;  %v3188_v31 = vld [vmem:[%s4357_s12 + $0x30] sm:$0xff] }
 0x8c1   :  { %v4045_v46 = vpack.c.bf16 %v1689_v38, %v1689_v38 }
 0x8c3   :  { %v1738_v34 = vunpack.c.l.b16 %v4045_v46 }
 0x8c4   :  { %v1679_v36 = vpop.f32.mrf.mxu2 }
 0x8c5   :  { %v1743_v25 = vpack.c.b16 %v1738_v34, %v1737_v33  ;;  %v1680_v45 = vadd.f32 %v3223_v52, %v1679_v36  ;;  %v1823_v33 = vunpack.c.l.bf16 %v4043_v26  ;;  %v1824_v34 = vunpack.c.l.bf16 %v4045_v46 }
 0x8c7   :  { %3011 = vmatmul.msk.bf16.gmra.mxu2 %vm924_vm0, %v1743_v25  ;;  %v1690_v37 = vmax.f32 %v1680_v45, 0.0 }
 0x8c9   :  { %v4050_v41 = vpack.c.bf16 %v1690_v37, %v1690_v37 }
 0x8cb   :  { %v1739_v32 = vunpack.c.l.b16 %v4050_v41 }
 0x8cc   :  { %v1681_v44 = vpop.f32.mrf.mxu2 }
 0x8cd   :  { %v1682_v47 = vadd.f32 %v3223_v52, %v1681_v44 }
 0x8cf   :  { %v1691_v42 = vmax.f32 %v1682_v47, 0.0 }
 0x8d1   :  { %v4052_v20 = vpack.c.bf16 %v1691_v42, %v1691_v42 }
 0x8d3   :  { %v1740_v43 = vunpack.c.l.b16 %v4052_v20  ;;  %v1826_v26 = vunpack.c.l.bf16 %v4052_v20  ;;  %v3182_v20 = vld [vmem:[%s4357_s12] sm:$0xff] }
 0x8d5   :  { %v1744_v53 = vpack.c.b16 %v1740_v43, %v1739_v32  ;;  %v1825_v43 = vunpack.c.l.bf16 %v4050_v41  ;;  %v3183_v41 = vld [vmem:[%s4357_s12 + $0x8] sm:$0xff] }
 0x8d7   :  { %1753 = vmatpush.bf16.msrb.mxu3 %v1744_v53  ;;  %3012 = vmatmul.msk.bf16.gmra.mxu2 %vm924_vm0, %v1744_v53 }
 0x8db   :  { %1754 = vmatpush.bf16.msrb.mxu3 %v1743_v25  ;;  %v3186_v25 = vld [vmem:[%s4357_s12 + $0x20] sm:$0xff]  ;;  %s3268_s12 = smov 106  }
 0x8df   :  { %1755 = vmatpush.bf16.msrb.mxu3 %v1742_v18 }
 0x8e3   :  { %1756 = vmatpush.bf16.msrb.mxu3 %v1741_v16 }
 0x8e6   :  { %2965 = vmatmul.msk.bf16.vlgmr.msrb.gmra.mxu3 %vm924_vm0, %v4060_v49 }
 0x8e7   :  { %2009 = vmatpush.bf16.msra.mxu3 %v3181_v62 }
 0x8eb   :  { %2010 = vmatpush.bf16.msra.mxu3 %v3180_v63 }
 0x8ef   :  { %2011 = vmatpush.bf16.msra.mxu3 %v3179_v13 }
 0x8f3   :  { %2012 = vmatpush.bf16.msra.mxu3 %v3178_v27 }
 0x8f6   :  { %2966 = vmatmul.msk.bf16.gmra.mxu3 %vm924_vm0, %v4067_v50 }
 0x906   :  { %2967 = vmatmul.msk.bf16.gmra.mxu3 %vm924_vm0, %v4074_v40 }
 0x916   :  { %2968 = vmatmul.msk.bf16.gmra.mxu3 %vm924_vm0, %v4081_v54 }
 0x969   :  { %v1758_v57 = vpop.f32.mrf.mxu3 }
 0x971   :  { %v1760_v14 = vpop.f32.mrf.mxu3 }
 0x972   :  { %v1778_v48 = vpack.c.bf16 %v1760_v14, %v1758_v57  ;;  %v1949_v14 = vpop.f32.mrf.mxu2 }
 0x974   :  { %2989 = vmatmul.msk.bf16.vlgmr.msra.gmra.mxu1 %vm924_vm0, %v1778_v48 }
 0x979   :  { %v1763_v60 = vpop.f32.mrf.mxu3 }
 0x981   :  { %v1765_v56 = vpop.f32.mrf.mxu3 }
 0x982   :  { %v1779_v19 = vpack.c.bf16 %v1765_v56, %v1763_v60  ;;  %v1951_v60 = vpop.f32.mrf.mxu2 }
 0x984   :  { %2990 = vmatmul.msk.bf16.gmra.mxu1 %vm924_vm0, %v1779_v19 }
 0x989   :  { %v1768_v30 = vpop.f32.mrf.mxu3 }
 0x991   :  { %v1770_v61 = vpop.f32.mrf.mxu3 }
 0x992   :  { %v1780_v7 = vpack.c.bf16 %v1770_v61, %v1768_v30  ;;  %v1954_v61 = vpop.f32.mrf.mxu2 }
 0x994   :  { %2991 = vmatmul.msk.bf16.gmra.mxu1 %vm924_vm0, %v1780_v7 }
 0x999   :  { %v1773_v59 = vpop.f32.mrf.mxu3 }
 0x9a1   :  { %v1775_v2 = vpop.f32.mrf.mxu3 }
 0x9a2   :  { %v1781_v52 = vpack.c.bf16 %v1775_v2, %v1773_v59  ;;  %v3224_v59 = vld [vmem:[%s4355_s11] ss:$0 sm:$0xff]  ;;  %s3267_s11 = smov 117  }
 0x9a4   :  { %1786 = vmatpush.bf16.msrb.mxu0 %v1781_v52  ;;  %2992 = vmatmul.msk.bf16.gmra.mxu1 %vm924_vm0, %v1781_v52 }
 0x9a8   :  { %1787 = vmatpush.bf16.msrb.mxu0 %v1780_v7 }
 0x9ac   :  { %1788 = vmatpush.bf16.msrb.mxu0 %v1779_v19 }
 0x9b0   :  { %1789 = vmatpush.bf16.msrb.mxu0 %v1778_v48 }
 0x9b3   :  { %2969 = vmatmul.msk.bf16.vlgmr.msrb.gmra.mxu0 %vm924_vm0, %v4060_v49 }
 0x9b4   :  { %2130 = vmatpush.bf16.msra.mxu0 %v3189_v5 }
 0x9b8   :  { %2131 = vmatpush.bf16.msra.mxu0 %v3188_v31 }
 0x9bc   :  { %2132 = vmatpush.bf16.msra.mxu0 %v3187_v24 }
 0x9c0   :  { %2133 = vmatpush.bf16.msra.mxu0 %v3186_v25 }
 0x9c3   :  { %2970 = vmatmul.msk.bf16.gmra.mxu0 %vm924_vm0, %v4067_v50 }
 0x9c4   :  { %2134 = vmatpush.bf16.msra.mxu0 %v3185_v21 }
 0x9c8   :  { %2135 = vmatpush.bf16.msra.mxu0 %v3184_v55 }
 0x9cc   :  { %2136 = vmatpush.bf16.msra.mxu0 %v3183_v41 }
 0x9d0   :  { %2137 = vmatpush.bf16.msra.mxu0 %v3182_v20 }
 0x9d3   :  { %2971 = vmatmul.msk.bf16.gmra.mxu0 %vm924_vm0, %v4074_v40 }
 0x9e3   :  { %2972 = vmatmul.msk.bf16.gmra.mxu0 %vm924_vm0, %v4081_v54 }
 0x9f1   :  { %v1884_v57 = vpop.f32.mrf.mxu1 }
 0x9f2   :  { %v1950_v30 = vadd.f32 %v1949_v14, %v1884_v57 }
 0x9f9   :  { %v1886_v48 = vpop.f32.mrf.mxu1 }
 0x9fa   :  { %v1952_v2 = vadd.f32 %v1951_v60, %v1886_v48 }
 0xa01   :  { %v1889_v19 = vpop.f32.mrf.mxu1 }
 0xa09   :  { %v1891_v27 = vpop.f32.mrf.mxu1 }
 0xa30   :  { %v1791_v4 = vpop.f32.mrf.mxu0 }
 0xa31   :  { %v1811_v6 = vmul.f32 2.0, %v1791_v4 }
 0xa33   :  { %v1827_v9 = vsub.f32 %v1811_v6, %v1819_v10 }
 0xa38   :  { %v1793_v11 = vpop.f32.mrf.mxu0 }
 0xa39   :  { %v1812_v16 = vmul.f32 2.0, %v1793_v11  ;;  %v1956_v11 = vpop.f32.mrf.mxu2 }
 0xa3b   :  { %v1828_v3 = vsub.f32 %v1812_v16, %v1820_v1  ;;  %v1955_v16 = vadd.f32 %v1954_v61, %v1889_v19 }
 0xa3d   :  { %v1835_v12 = vpack.c.bf16 %v1828_v3, %v1827_v9  ;;  %v1894_v3 = vpop.f32.mrf.mxu1 }
 0xa3f   :  { %3029 = vmatmul.msk.bf16.vlgmr.msra.gmra.mxu3 %vm924_vm0, %v1835_v12  ;;  %v1957_v12 = vadd.f32 %v1956_v11, %v1891_v27 }
 0xa40   :  { %v1796_v0 = vpop.f32.mrf.mxu0 }
 0xa41   :  { %v1813_v15 = vmul.f32 2.0, %v1796_v0  ;;  %v1959_v0 = vpop.f32.mrf.mxu2 }
 0xa42   :  { %v1960_v31 = vadd.f32 %v1959_v0, %v1894_v3 }
 0xa43   :  { %v1829_v58 = vsub.f32 %v1813_v15, %v1821_v23 }
 0xa48   :  { %v1798_v22 = vpop.f32.mrf.mxu0 }
 0xa49   :  { %v1814_v18 = vmul.f32 2.0, %v1798_v22 }
 0xa4b   :  { %v1830_v39 = vsub.f32 %v1814_v18, %v1822_v28 }
 0xa4d   :  { %v1836_v29 = vpack.c.bf16 %v1830_v39, %v1829_v58 }
 0xa4f   :  { %3030 = vmatmul.msk.bf16.gmra.mxu3 %vm924_vm0, %v1836_v29  ;;  %v1896_v29 = vpop.f32.mrf.mxu1 }
 0xa50   :  { %v1801_v8 = vpop.f32.mrf.mxu0 }
 0xa51   :  { %v1815_v17 = vmul.f32 2.0, %v1801_v8  ;;  %v1961_v8 = vpop.f32.mrf.mxu2 }
 0xa53   :  { %v1831_v45 = vsub.f32 %v1815_v17, %v1823_v33  ;;  %v1962_v17 = vadd.f32 %v1961_v8, %v1896_v29 }
 0xa58   :  { %v1803_v38 = vpop.f32.mrf.mxu0 }
 0xa59   :  { %v1816_v36 = vmul.f32 2.0, %v1803_v38 }
 0xa5b   :  { %v1832_v37 = vsub.f32 %v1816_v36, %v1824_v34  ;;  %v1899_v36 = vpop.f32.mrf.mxu1 }
 0xa5d   :  { %v1837_v44 = vpack.c.bf16 %v1832_v37, %v1831_v45  ;;  %v1964_v45 = vpop.f32.mrf.mxu2 }
 0xa5f   :  { %3031 = vmatmul.msk.bf16.gmra.mxu3 %vm924_vm0, %v1837_v44 }
 0xa60   :  { %v1806_v47 = vpop.f32.mrf.mxu0 }
 0xa61   :  { %v1817_v42 = vmul.f32 2.0, %v1806_v47 }
 0xa63   :  { %v1833_v53 = vsub.f32 %v1817_v42, %v1825_v43  ;;  %v1901_v43 = vpop.f32.mrf.mxu1 }
 0xa68   :  { %v1808_v32 = vpop.f32.mrf.mxu0 }
 0xa69   :  { %v1818_v46 = vmul.f32 2.0, %v1808_v32  ;;  %v1965_v32 = vadd.f32 %v1964_v45, %v1899_v36 }
 0xa6b   :  { %v1834_v51 = vsub.f32 %v1818_v46, %v1826_v26  ;;  %v1966_v46 = vpop.f32.mrf.mxu2 }
 0xa6d   :  { %v1838_v35 = vpack.c.bf16 %v1834_v51, %v1833_v53  ;;  %v1967_v53 = vadd.f32 %v1966_v46, %v1901_v43 }
 0xa6f   :  { %3032 = vmatmul.msk.bf16.gmra.mxu3 %vm924_vm0, %v1838_v35 }
 0xac2   :  { %v2014_v56 = vpop.f32.mrf.mxu3 }
 0xac3   :  { %v2034_v7 = vadd.f32 %v2014_v56, %v1950_v30 }
 0xac5   :  { %v2045_v62 = vadd.f32 %v3224_v59, %v2034_v7 }
 0xac7   :  { %v2053_v4 = vmax.f32 %v2045_v62, 0.0 }
 0xaca   :  { %v2016_v52 = vpop.f32.mrf.mxu3 }
 0xacb   :  { %v2035_v63 = vadd.f32 %v2016_v52, %v1952_v2 }
 0xacd   :  { %v2046_v13 = vadd.f32 %v3224_v59, %v2035_v63 }
 0xacf   :  { %v2054_v6 = vmax.f32 %v2046_v13, 0.0 }
 0xad1   :  { %v2061_v10 = vpack.c.bf16 %v2054_v6, %v2053_v4 }
 0xad2   :  { %v2019_v1 = vpop.f32.mrf.mxu3 }
 0xad3   :  { %2138 = vmatmul.bf16.vlgmr.msra.gmra.mxu0 %v2061_v10  ;;  %v2036_v9 = vadd.f32 %v2019_v1, %v1955_v16 }
 0xad5   :  { %v2047_v22 = vadd.f32 %v3224_v59, %v2036_v9 }
 0xad7   :  { %v2055_v18 = vmax.f32 %v2047_v22, 0.0 }
 0xada   :  { %v2021_v15 = vpop.f32.mrf.mxu3 }
 0xadb   :  { %v2037_v23 = vadd.f32 %v2021_v15, %v1957_v12 }
 0xadd   :  { %v2048_v28 = vadd.f32 %v3224_v59, %v2037_v23 }
 0xadf   :  { %v2056_v58 = vmax.f32 %v2048_v28, 0.0 }
 0xae1   :  { %v2062_v39 = vpack.c.bf16 %v2056_v58, %v2055_v18 }
 0xae2   :  { %v2024_v5 = vpop.f32.mrf.mxu3 }
 0xae3   :  { %2143 = vmatmul.bf16.gmra.mxu0 %v2062_v39  ;;  %v2038_v24 = vadd.f32 %v2024_v5, %v1960_v31 }
 0xae5   :  { %v2049_v33 = vadd.f32 %v3224_v59, %v2038_v24  ;;  %v4235_v24 = vld [vmem:[%s4358_s13] ss:$0 sm:$0xff] }
 0xae7   :  { %v2057_v37 = vmax.f32 %v2049_v33, 0.0 }
 0xaea   :  { %v2026_v38 = vpop.f32.mrf.mxu3 }
 0xaeb   :  { %v2039_v34 = vadd.f32 %v2026_v38, %v1962_v17 }
 0xaed   :  { %v2050_v25 = vadd.f32 %v3224_v59, %v2039_v34 }
 0xaef   :  { %v2058_v44 = vmax.f32 %v2050_v25, 0.0 }
 0xaf1   :  { %v2063_v47 = vpack.c.bf16 %v2058_v44, %v2057_v37 }
 0xaf2   :  { %v2029_v42 = vpop.f32.mrf.mxu3 }
 0xaf3   :  { %2148 = vmatmul.bf16.gmra.mxu0 %v2063_v47  ;;  %v2040_v26 = vadd.f32 %v2029_v42, %v1965_v32 }
 0xaf5   :  { %v2051_v35 = vadd.f32 %v3224_v59, %v2040_v26 }
 0xaf7   :  { %v2059_v41 = vmax.f32 %v2051_v35, 0.0 }
 0xafa   :  { %v2031_v51 = vpop.f32.mrf.mxu3 }
 0xafb   :  { %v2041_v21 = vadd.f32 %v2031_v51, %v1967_v53 }
 0xafd   :  { %v2052_v55 = vadd.f32 %v3224_v59, %v2041_v21 }
 0xaff   :  { %v2060_v20 = vmax.f32 %v2052_v55, 0.0 }
 0xb01   :  { %v2064_v57 = vpack.c.bf16 %v2060_v20, %v2059_v41 }
 0xb03   :  { %2153 = vmatmul.bf16.gmra.mxu0 %v2064_v57 }
 0xb50   :  { %v4160_v14 = vpop.f32.mrf.mxu0 }
 0xb58   :  { %v4162_v48 = vpop.f32.mrf.mxu0 }
 0xb59   :  { %v2159_v62 = vpack.c.bf16 %v4162_v48, %v4160_v14 }
 0xb60   :  { %v4164_v60 = vpop.f32.mrf.mxu0 }
 0xb68   :  { %v4166_v56 = vpop.f32.mrf.mxu0 }
 0xb69   :  { %v2160_v19 = vpack.c.bf16 %v4166_v56, %v4164_v60 }
 0xb6b   :  { %2169 = vrot.lane.b32.xlu1 %v2160_v19, %s3267_s11 }
 0xb70   :  { %v4171_v30 = vpop.f32.mrf.mxu0 }
 0xb78   :  { %v4173_v61 = vpop.f32.mrf.mxu0 }
 0xb79   :  { %v2161_v7 = vpack.c.bf16 %v4173_v61, %v4171_v30 }
 0xb7b   :  { %2171 = vrot.lane.b32.xlu0 %v2161_v7, %s3267_s11 }
 0xb80   :  { %v4178_v59 = vpop.f32.mrf.mxu0 }
 0xb88   :  { %v4180_v2 = vpop.f32.mrf.mxu0 }
 0xb89   :  { %v2162_v52 = vpack.c.bf16 %v4180_v2, %v4178_v59 }
 0xb8b   :  { %2173 = vrot.lane.b32.xlu2 %v2162_v52, %s3267_s11 }
 0xb93   :  { %2167 = vrot.lane.b32.xlu2 %v2159_v62, %s3267_s11 }
 0xbdd   :  { %v2170_v27 = vpop.permute.xlu1 %2169 }
 0xbe5   :  { %v2174_v63 = vpop.permute.xlu2 %2173 }
 0xbe6   :  { %2183 = vmatpush.bf16.msrb.mxu1 %v2174_v63 }
 0xbed   :  { %v2172_v13 = vpop.permute.xlu0 %2171  ;;  %v2168_v4 = vpop.permute.xlu2 %2167 }
 0xbee   :  { %2184 = vmatpush.bf16.msrb.mxu1 %v2172_v13 }
 0xbf2   :  { %2185 = vmatpush.bf16.msrb.mxu1 %v2170_v27 }
 0xbf6   :  { %2186 = vmatpush.bf16.msrb.mxu1 %v2168_v4 }
 0xbf9   :  { %3065 = vmatmul.msk.bf16.vlgmr.msrb.gmra.mxu1 %vm924_vm0, %v4060_v49 }
 0xc09   :  { %3066 = vmatmul.msk.bf16.gmra.mxu1 %vm924_vm0, %v4067_v50 }
 0xc19   :  { %3067 = vmatmul.msk.bf16.gmra.mxu1 %vm924_vm0, %v4074_v40 }
 0xc29   :  { %3068 = vmatmul.msk.bf16.gmra.mxu1 %vm924_vm0, %v4081_v54 }
 0xc76   :  { %v2188_v6 = vpop.f32.mrf.mxu1 }
 0xc77   :  { %v2257_v5 = vadd.f32 %v2188_v6, %v4160_v14 }
 0xc7e   :  { %v2190_v11 = vpop.f32.mrf.mxu1 }
 0xc7f   :  { %v2208_v23 = vpack.c.bf16 %v2190_v11, %v2188_v6  ;;  %v2258_v38 = vadd.f32 %v2190_v11, %v4162_v48 }
 0xc86   :  { %v2193_v10 = vpop.f32.mrf.mxu1 }
 0xc87   :  { %v2259_v44 = vadd.f32 %v2193_v10, %v4164_v60 }
 0xc8e   :  { %v4196_v1 = vpop.f32.mrf.mxu1 }
 0xc8f   :  { %v2209_v16 = vpack.c.bf16 %v4196_v1, %v2193_v10  ;;  %v2260_v51 = vadd.f32 %v4196_v1, %v4166_v56 }
 0xc91   :  { %2218 = vrot.lane.b32.xlu2 %v2209_v16, %s3267_s11 }
 0xc96   :  { %v4200_v9 = vpop.f32.mrf.mxu1 }
 0xc99   :  { %2291 = vrot.lane.b32.xlu2 %v4162_v48, %s3268_s12  ;;  %v2261_v48 = vadd.f32 %v4200_v9, %v4171_v30 }
 0xc9e   :  { %v4203_v3 = vpop.f32.mrf.mxu1 }
 0xc9f   :  { %v2210_v12 = vpack.c.bf16 %v4203_v3, %v4200_v9  ;;  %v2262_v13 = vadd.f32 %v4203_v3, %v4173_v61 }
 0xca1   :  { %2297 = vrot.lane.b32.xlu2 %v4171_v30, %s3268_s12  ;;  %2220 = vrot.lane.b32.xlu1 %v2210_v12, %s3267_s11 }
 0xca6   :  { %v4209_v0 = vpop.f32.mrf.mxu1 }
 0xca7   :  { %v2263_v16 = vadd.f32 %v4209_v0, %v4178_v59 }
 0xca9   :  { %2303 = vrot.lane.b32.xlu2 %v4180_v2, %s3268_s12  ;;  %2289 = vrot.lane.b32.xlu1 %v4160_v14, %s3268_s12 }
 0xcae   :  { %v4213_v15 = vpop.f32.mrf.mxu1 }
 0xcaf   :  { %v2211_v22 = vpack.c.bf16 %v4213_v15, %v4209_v0 }
 0xcb1   :  { %2295 = vrot.lane.b32.xlu1 %v4166_v56, %s3268_s12  ;;  %2222 = vrot.lane.b32.xlu0 %v2211_v22, %s3267_s11 }
 0xcb9   :  { %2301 = vrot.lane.b32.xlu1 %v4178_v59, %s3268_s12  ;;  %2216 = vrot.lane.b32.xlu0 %v2208_v23, %s3267_s11 }
 0xcc1   :  { %2293 = vrot.lane.b32.xlu0 %v4164_v60, %s3268_s12 }
 0xcc9   :  { %2299 = vrot.lane.b32.xlu0 %v4173_v61, %s3268_s12 }
 0xceb   :  { %v2219_v58 = vpop.permute.xlu2 %2218 }
 0xcf3   :  { %v2292_v36 = vpop.permute.xlu2 %2291 }
 0xcfb   :  { %v2298_v52 = vpop.permute.xlu2 %2297 }
 0xd13   :  { %v2221_v18 = vpop.permute.xlu1 %2220 }
 0xd23   :  { %v2223_v28 = vpop.permute.xlu0 %2222 }
 0xd24   :  { %2232 = vmatpush.bf16.msrb.mxu2 %v2223_v28 }
 0xd28   :  { %2233 = vmatpush.bf16.msrb.mxu2 %v2221_v18  ;;  %v2264_v18 = vadd.f32 %v4213_v15, %v4180_v2 }
 0xd2b   :  { %v2217_v39 = vpop.permute.xlu0 %2216 }
 0xd2c   :  { %2234 = vmatpush.bf16.msrb.mxu2 %v2219_v58 }
 0xd30   :  { %2235 = vmatpush.bf16.msrb.mxu2 %v2217_v39 }
 0xd33   :  { %3069 = vmatmul.msk.bf16.vlgmr.msrb.gmra.mxu2 %vm924_vm0, %v4060_v49  ;;  %v2290_v49 = vpop.permute.xlu1 %2289  ;;  %v2294_v43 = vpop.permute.xlu0 %2293 }
 0xd3b   :  { %v2296_v41 = vpop.permute.xlu1 %2295  ;;  %v2300_v11 = vpop.permute.xlu0 %2299 }
 0xd43   :  { %3070 = vmatmul.msk.bf16.gmra.mxu2 %vm924_vm0, %v4067_v50  ;;  %v2302_v23 = vpop.permute.xlu1 %2301 }
 0xd53   :  { %3071 = vmatmul.msk.bf16.gmra.mxu2 %vm924_vm0, %v4074_v40 }
 0xd63   :  { %3072 = vmatmul.msk.bf16.gmra.mxu2 %vm924_vm0, %v4081_v54 }
 0xdb6   :  { %v2237_v29 = vpop.f32.mrf.mxu2 }
 0xdb7   :  { %v2265_v8 = vmul.f32 2.0, %v2237_v29 }
 0xdb9   :  { %v2273_v31 = vadd.f32 %v2265_v8, %v2257_v5  ;;  %v2304_v5 = vpop.permute.xlu2 %2303 }
 0xdbb   :  { %v2313_v17 = vsub.f32 %v2273_v31, %v2290_v49 }
 0xdbd   :  { %v4238_v50 = vadd.f32 %v4235_v24, %v2313_v17 }
 0xdbe   :  { %v2239_v40 = vpop.f32.mrf.mxu2 }
 0xdbf   :  { %v2266_v54 = vmul.f32 2.0, %v2239_v40  ;;  %v2333_v33 = vsel %vm2332_vm5, %v4238_v50, -inf }
 0xdc0   :  { %2334 = vmax.xlane.f32.xlu0 %v2333_v33 }
 0xdc1   :  { %v2274_v34 = vadd.f32 %v2266_v54, %v2258_v38 }
 0xdc3   :  { %v2314_v25 = vsub.f32 %v2274_v34, %v2292_v36 }
 0xdc5   :  { %v4244_v45 = vadd.f32 %v4235_v24, %v2314_v25 }
 0xdc6   :  { %v2242_v37 = vpop.f32.mrf.mxu2 }
 0xdc7   :  { %v2267_v47 = vmul.f32 2.0, %v2242_v37  ;;  %v2336_v42 = vsel %vm2332_vm5, %v4244_v45, -inf }
 0xdc8   :  { %2337 = vmax.xlane.f32.xlu1 %v2336_v42 }
 0xdc9   :  { %v2275_v32 = vadd.f32 %v2267_v47, %v2259_v44 }
 0xdcb   :  { %v2315_v26 = vsub.f32 %v2275_v32, %v2294_v43 }
 0xdcd   :  { %v2326_v46 = vadd.f32 %v4235_v24, %v2315_v26 }
 0xdce   :  { %v2244_v53 = vpop.f32.mrf.mxu2 }
 0xdcf   :  { %v2268_v35 = vmul.f32 2.0, %v2244_v53  ;;  %v2339_v21 = vsel %vm2332_vm5, %v2326_v46, -inf }
 0xdd0   :  { %2340 = vmax.xlane.f32.xlu2 %v2339_v21 }
 0xdd1   :  { %v2276_v55 = vadd.f32 %v2268_v35, %v2260_v51 }
 0xdd3   :  { %v2316_v20 = vsub.f32 %v2276_v55, %v2296_v41 }
 0xdd5   :  { %v2327_v57 = vadd.f32 %v4235_v24, %v2316_v20 }
 0xdd6   :  { %v2247_v14 = vpop.f32.mrf.mxu2 }
 0xdd7   :  { %v2269_v60 = vmul.f32 2.0, %v2247_v14  ;;  %v2342_v19 = vsel %vm2332_vm5, %v2327_v57, -inf }
 0xdd8   :  { %2343 = vmax.xlane.f32.xlu2 %v2342_v19 }
 0xdd9   :  { %v2277_v7 = vadd.f32 %v2269_v60, %v2261_v48 }
 0xddb   :  { %v2317_v56 = vsub.f32 %v2277_v7, %v2298_v52 }
 0xddd   :  { %v2328_v62 = vadd.f32 %v4235_v24, %v2317_v56 }
 0xdde   :  { %v2249_v63 = vpop.f32.mrf.mxu2 }
 0xddf   :  { %v2270_v27 = vmul.f32 2.0, %v2249_v63  ;;  %v2345_v4 = vsel %vm2332_vm5, %v2328_v62, -inf }
 0xde0   :  { %2346 = vmax.xlane.f32.xlu0 %v2345_v4 }
 0xde1   :  { %v2278_v6 = vadd.f32 %v2270_v27, %v2262_v13 }
 0xde3   :  { %v2318_v30 = vsub.f32 %v2278_v6, %v2300_v11 }
 0xde5   :  { %v2329_v10 = vadd.f32 %v4235_v24, %v2318_v30 }
 0xde6   :  { %v2252_v1 = vpop.f32.mrf.mxu2 }
 0xde7   :  { %v2271_v9 = vmul.f32 2.0, %v2252_v1  ;;  %v2348_v12 = vsel %vm2332_vm5, %v2329_v10, -inf }
 0xde8   :  { %2349 = vmax.xlane.f32.xlu1 %v2348_v12 }
 0xde9   :  { %v2279_v22 = vadd.f32 %v2271_v9, %v2263_v16 }
 0xdeb   :  { %v2319_v61 = vsub.f32 %v2279_v22, %v2302_v23 }
 0xded   :  { %v2330_v3 = vadd.f32 %v4235_v24, %v2319_v61 }
 0xdee   :  { %v2254_v28 = vpop.f32.mrf.mxu2 }
 0xdef   :  { %v2272_v58 = vmul.f32 2.0, %v2254_v28  ;;  %v2351_v39 = vsel %vm2332_vm5, %v2330_v3, -inf }
 0xdf0   :  { %2352 = vmax.xlane.f32.xlu2 %v2351_v39 }
 0xdf1   :  { %v2280_v29 = vadd.f32 %v2272_v58, %v2264_v18 }
 0xdf3   :  { %v2320_v59 = vsub.f32 %v2280_v29, %v2304_v5 }
 0xdf5   :  { %v2331_v0 = vadd.f32 %v4235_v24, %v2320_v59 }
 0xdf7   :  { %v2354_v8 = vsel %vm2332_vm5, %v2331_v0, -inf }
 0xdf8   :  { %2355 = vmax.xlane.f32.xlu0 %v2354_v8 }
 0xe33   :  { %v2335_v31 = vpop.xlane.xlu0 %2334 }
 0xe34   :  { %v2357_v49 = vsub.f32 %v4238_v50, %v2335_v31 }
 0xe36   :  { %v2365_v17 = vmul.f32 1.442695, %v2357_v49 }
 0xe38   :  { %3226 = vpow2.f32 %v2365_v17 }
 0xe3b   :  { %v2338_v40 = vpop.xlane.xlu1 %2337 }
 0xe3c   :  { %v2358_v2 = vsub.f32 %v4244_v45, %v2338_v40 }
 0xe3e   :  { %v4273_v15 = vpop.eup %3226  ;;  %v2367_v38 = vmul.f32 1.442695, %v2358_v2 }
 0xe3f   :  { %v2381_v54 = vsel %vm2332_vm5, %v4273_v15, 0.0 }
 0xe40   :  { %3228 = vpow2.f32 %v2367_v38  ;;  %2382 = vadd.xlane.f32.xlu1 %v2381_v54 }
 0xe43   :  { %v2341_v24 = vpop.xlane.xlu2 %2340 }
 0xe44   :  { %v2359_v33 = vsub.f32 %v2326_v46, %v2341_v24 }
 0xe46   :  { %v4277_v34 = vpop.eup %3228  ;;  %v2369_v36 = vmul.f32 1.442695, %v2359_v33 }
 0xe47   :  { %v2384_v50 = vsel %vm2332_vm5, %v4277_v34, 0.0 }
 0xe48   :  { %3230 = vpow2.f32 %v2369_v36  ;;  %2385 = vadd.xlane.f32.xlu2 %v2384_v50 }
 0xe4b   :  { %v2344_v25 = vpop.xlane.xlu2 %2343 }
 0xe4c   :  { %v2360_v45 = vsub.f32 %v2327_v57, %v2344_v25 }
 0xe4e   :  { %v4281_v37 = vpop.eup %3230  ;;  %v2371_v44 = vmul.f32 1.442695, %v2360_v45 }
 0xe4f   :  { %v2387_v47 = vsel %vm2332_vm5, %v4281_v37, 0.0 }
 0xe50   :  { %3232 = vpow2.f32 %v2371_v44  ;;  %2388 = vadd.xlane.f32.xlu0 %v2387_v47 }
 0xe53   :  { %v2347_v42 = vpop.xlane.xlu0 %2346 }
 0xe54   :  { %v2361_v32 = vsub.f32 %v2328_v62, %v2347_v42 }
 0xe56   :  { %v4285_v43 = vpop.eup %3232  ;;  %v2373_v26 = vmul.f32 1.442695, %v2361_v32 }
 0xe57   :  { %v2390_v46 = vsel %vm2332_vm5, %v4285_v43, 0.0 }
 0xe58   :  { %3234 = vpow2.f32 %v2373_v26  ;;  %2391 = vadd.xlane.f32.xlu1 %v2390_v46 }
 0xe5b   :  { %v2350_v53 = vpop.xlane.xlu1 %2349 }
 0xe5c   :  { %v2362_v51 = vsub.f32 %v2329_v10, %v2350_v53 }
 0xe5e   :  { %v4289_v35 = vpop.eup %3234  ;;  %v2375_v21 = vmul.f32 1.442695, %v2362_v51 }
 0xe5f   :  { %v2393_v55 = vsel %vm2332_vm5, %v4289_v35, 0.0 }
 0xe60   :  { %3236 = vpow2.f32 %v2375_v21  ;;  %2394 = vadd.xlane.f32.xlu2 %v2393_v55 }
 0xe63   :  { %v2353_v41 = vpop.xlane.xlu2 %2352 }
 0xe64   :  { %v2363_v20 = vsub.f32 %v2330_v3, %v2353_v41 }
 0xe66   :  { %v4293_v57 = vpop.eup %3236  ;;  %v2377_v14 = vmul.f32 1.442695, %v2363_v20 }
 0xe67   :  { %v2396_v48 = vsel %vm2332_vm5, %v4293_v57, 0.0 }
 0xe68   :  { %3238 = vpow2.f32 %v2377_v14  ;;  %2397 = vadd.xlane.f32.xlu0 %v2396_v48 }
 0xe6b   :  { %v2356_v60 = vpop.xlane.xlu0 %2355 }
 0xe6c   :  { %v2364_v19 = vsub.f32 %v2331_v0, %v2356_v60 }
 0xe6e   :  { %v4297_v7 = vpop.eup %3238  ;;  %v2379_v52 = vmul.f32 1.442695, %v2364_v19 }
 0xe6f   :  { %v2399_v56 = vsel %vm2332_vm5, %v4297_v7, 0.0 }
 0xe70   :  { %3240 = vpow2.f32 %v2379_v52  ;;  %2400 = vadd.xlane.f32.xlu1 %v2399_v56 }
 0xe76   :  { %v4301_v62 = vpop.eup %3240 }
 0xe77   :  { %v2402_v63 = vsel %vm2332_vm5, %v4301_v62, 0.0 }
 0xe78   :  { %2403 = vadd.xlane.f32.xlu2 %v2402_v63 }
 0xeb3   :  { %v2383_v13 = vpop.xlane.xlu1 %2382 }
 0xeb4   :  { %3242 = vrcp.f32 %v2383_v13  ;;  %v2416_v30 = vand.u32 2147483648, %v2383_v13  ;;  %v2414_v1 = vand.u32 2147483647, %v2383_v13  ;;  %vm2410_vm7 = vweird.f32 %v2383_v13 }
 0xeb6   :  { %v2417_v12 = vor.u32 1.1754944e-38, %v2416_v30  ;;  %vm2415_vm9 = vcmp.eq.f32.partialorder %v2414_v1, 8.507059e+37 }
 0xeba   :  { %v3243_v27 = vpop.eup %3242 }
 0xebb   :  { %v2406_v4 = vmul.f32 %v3243_v27, %v2383_v13  ;;  %v2386_v6 = vpop.xlane.xlu2 %2385  ;;  %vm2411_vm6 = vweird.f32 %v3243_v27 }
 0xebc   :  { %3244 = vrcp.f32 %v2386_v6  ;;  %vm2412_vm8 = vmor %vm2410_vm7, %vm2411_vm6  ;;  %v2431_v58 = vand.u32 2147483648, %v2386_v6  ;;  %v2429_v5 = vand.u32 2147483647, %v2386_v6  ;;  %vm2425_vm11 = vweird.f32 %v2386_v6 }
 0xebd   :  { %v2407_v11 = vsub.f32 1.0, %v2406_v4 }
 0xebe   :  { %v2432_v8 = vor.u32 1.1754944e-38, %v2431_v58  ;;  %vm2430_vm13 = vcmp.eq.f32.partialorder %v2429_v5, 8.507059e+37 }
 0xebf   :  { %v2408_v10 = vmul.f32 %v3243_v27, %v2407_v11 }
 0xec1   :  { %v2409_v16 = vadd.f32 %v3243_v27, %v2408_v10 }
 0xec2   :  { %v3245_v9 = vpop.eup %3244 }
 0xec3   :  { %v2413_v22 = vsel %vm2412_vm8, %v3243_v27, %v2409_v16  ;;  %v2421_v23 = vmul.f32 %v3245_v9, %v2386_v6  ;;  %v2389_v61 = vpop.xlane.xlu0 %2388  ;;  %vm2426_vm10 = vweird.f32 %v3245_v9 }
 0xec4   :  { %v2418_v3 = vsel %vm2415_vm9, %v2417_v12, %v2413_v22  ;;  %3246 = vrcp.f32 %v2389_v61  ;;  %vm2427_vm12 = vmor %vm2425_vm11, %vm2426_vm10  ;;  %v2446_v38 = vand.u32 2147483648, %v2389_v61  ;;  %v2444_v33 = vand.u32 2147483647, %v2389_v61 }
 0xec5   :  { %v2419_v28 = vmul.f32 %v4273_v15, %v2418_v3  ;;  %v2422_v18 = vsub.f32 1.0, %v2421_v23  ;;  %vm2440_vm15 = vweird.f32 %v2389_v61 }
 0xec6   :  { %v2447_v25 = vor.u32 1.1754944e-38, %v2446_v38  ;;  %vm2445_vm1 = vcmp.eq.f32.partialorder %v2444_v33, 8.507059e+37 }
 0xec7   :  { %v2525_v39 = vsel %vm2332_vm5, %v2419_v28, 0.0  ;;  %v2423_v29 = vmul.f32 %v3245_v9, %v2422_v18 }
 0xec8   :  { %2533 = vst [vmem:[%s4359_s14] sm:$0xff] %v2525_v39 }
 0xec9   :  { %v2424_v59 = vadd.f32 %v3245_v9, %v2423_v29 }
 0xeca   :  { %v3247_v0 = vpop.eup %3246 }
 0xecb   :  { %v2428_v31 = vsel %vm2427_vm12, %v3245_v9, %v2424_v59  ;;  %v2436_v49 = vmul.f32 %v3247_v0, %v2389_v61  ;;  %v2392_v17 = vpop.xlane.xlu1 %2391  ;;  %vm2441_vm14 = vweird.f32 %v3247_v0 }
 0xecc   :  { %v2433_v40 = vsel %vm2430_vm13, %v2432_v8, %v2428_v31  ;;  %3248 = vrcp.f32 %v2392_v17  ;;  %vm2442_vm0 = vmor %vm2440_vm15, %vm2441_vm14  ;;  %v2461_v26 = vand.u32 2147483648, %v2392_v17  ;;  %v2459_v51 = vand.u32 2147483647, %v2392_v17 }
 0xecd   :  { %v2434_v2 = vmul.f32 %v4277_v34, %v2433_v40  ;;  %v2437_v15 = vsub.f32 1.0, %v2436_v49  ;;  %vm2455_vm3 = vweird.f32 %v2392_v17 }
 0xece   :  { %v2462_v41 = vor.u32 1.1754944e-38, %v2461_v26  ;;  %vm2460_vm6 = vcmp.eq.f32.partialorder %v2459_v51, 8.507059e+37 }
 0xecf   :  { %v2526_v54 = vsel %vm2332_vm5, %v2434_v2, 0.0  ;;  %v2438_v24 = vmul.f32 %v3247_v0, %v2437_v15 }
 0xed0   :  { %2534 = vst [vmem:[%s4359_s14 + $0x8] sm:$0xff] %v2526_v54 }
 0xed1   :  { %v2439_v36 = vadd.f32 %v3247_v0, %v2438_v24 }
 0xed2   :  { %v3249_v50 = vpop.eup %3248 }
 0xed3   :  { %v2443_v45 = vsel %vm2442_vm0, %v3247_v0, %v2439_v36  ;;  %v2451_v44 = vmul.f32 %v3249_v50, %v2392_v17  ;;  %v2395_v34 = vpop.xlane.xlu2 %2394  ;;  %vm2456_vm2 = vweird.f32 %v3249_v50 }
 0xed4   :  { %v2448_v47 = vsel %vm2445_vm1, %v2447_v25, %v2443_v45  ;;  %3250 = vrcp.f32 %v2395_v34  ;;  %vm2457_vm4 = vmor %vm2455_vm3, %vm2456_vm2  ;;  %v2476_v52 = vand.u32 2147483648, %v2395_v34  ;;  %v2474_v13 = vand.u32 2147483647, %v2395_v34 }
 0xed5   :  { %v2449_v42 = vmul.f32 %v4281_v37, %v2448_v47  ;;  %v2452_v32 = vsub.f32 1.0, %v2451_v44  ;;  %vm2470_vm8 = vweird.f32 %v2395_v34 }
 0xed6   :  { %v2477_v6 = vor.u32 1.1754944e-38, %v2476_v52  ;;  %vm2475_vm10 = vcmp.eq.f32.partialorder %v2474_v13, 8.507059e+37 }
 0xed7   :  { %v2527_v46 = vsel %vm2332_vm5, %v2449_v42, 0.0  ;;  %v2453_v53 = vmul.f32 %v3249_v50, %v2452_v32 }
 0xed8   :  { %2535 = vst [vmem:[%s4359_s14 + $0x10] sm:$0xff] %v2527_v46 }
 0xed9   :  { %v2454_v21 = vadd.f32 %v3249_v50, %v2453_v53 }
 0xeda   :  { %v3251_v55 = vpop.eup %3250 }
 0xedb   :  { %v2458_v20 = vsel %vm2457_vm4, %v3249_v50, %v2454_v21  ;;  %v2466_v14 = vmul.f32 %v3251_v55, %v2395_v34  ;;  %v2398_v37 = vpop.xlane.xlu0 %2397  ;;  %vm2471_vm7 = vweird.f32 %v3251_v55 }
 0xedc   :  { %v2463_v48 = vsel %vm2460_vm6, %v2462_v41, %v2458_v20  ;;  %3252 = vrcp.f32 %v2398_v37  ;;  %vm2472_vm9 = vmor %vm2470_vm8, %vm2471_vm7  ;;  %v2491_v9 = vand.u32 2147483648, %v2398_v37  ;;  %v2489_v23 = vand.u32 2147483647, %v2398_v37 }
 0xedd   :  { %v2464_v60 = vmul.f32 %v4285_v43, %v2463_v48  ;;  %v2467_v19 = vsub.f32 1.0, %v2466_v14  ;;  %vm2485_vm12 = vweird.f32 %v2398_v37 }
 0xede   :  { %v2492_v28 = vor.u32 1.1754944e-38, %v2491_v9  ;;  %vm2490_vm14 = vcmp.eq.f32.partialorder %v2489_v23, 8.507059e+37 }
 0xedf   :  { %v2528_v56 = vsel %vm2332_vm5, %v2464_v60, 0.0  ;;  %v2468_v63 = vmul.f32 %v3251_v55, %v2467_v19 }
 0xee0   :  { %2536 = vst [vmem:[%s4359_s14 + $0x18] sm:$0xff] %v2528_v56 }
 0xee1   :  { %v2469_v27 = vadd.f32 %v3251_v55, %v2468_v63 }
 0xee2   :  { %v3253_v4 = vpop.eup %3252 }
 0xee3   :  { %v2473_v11 = vsel %vm2472_vm9, %v3251_v55, %v2469_v27  ;;  %v2481_v30 = vmul.f32 %v3253_v4, %v2398_v37  ;;  %v2401_v43 = vpop.xlane.xlu1 %2400  ;;  %vm2486_vm11 = vweird.f32 %v3253_v4 }
 0xee4   :  { %v2478_v10 = vsel %vm2475_vm10, %v2477_v6, %v2473_v11  ;;  %3254 = vrcp.f32 %v2401_v43  ;;  %vm2487_vm13 = vmor %vm2485_vm12, %vm2486_vm11  ;;  %v2506_v59 = vand.u32 2147483648, %v2401_v43  ;;  %v2504_v31 = vand.u32 2147483647, %v2401_v43 }
 0xee5   :  { %v2479_v1 = vmul.f32 %v4289_v35, %v2478_v10  ;;  %v2482_v16 = vsub.f32 1.0, %v2481_v30  ;;  %vm2500_vm0 = vweird.f32 %v2401_v43 }
 0xee6   :  { %v2507_v40 = vor.u32 1.1754944e-38, %v2506_v59  ;;  %vm2505_vm2 = vcmp.eq.f32.partialorder %v2504_v31, 8.507059e+37 }
 0xee7   :  { %v2529_v12 = vsel %vm2332_vm5, %v2479_v1, 0.0  ;;  %v2483_v22 = vmul.f32 %v3253_v4, %v2482_v16 }
 0xee8   :  { %2537 = vst [vmem:[%s4359_s14 + $0x20] sm:$0xff] %v2529_v12 }
 0xee9   :  { %v2484_v61 = vadd.f32 %v3253_v4, %v2483_v22 }
 0xeea   :  { %v3255_v3 = vpop.eup %3254 }
 0xeeb   :  { %v2488_v18 = vsel %vm2487_vm13, %v3253_v4, %v2484_v61  ;;  %v2496_v58 = vmul.f32 %v3255_v3, %v2401_v43  ;;  %v2404_v35 = vpop.xlane.xlu2 %2403  ;;  %vm2501_vm15 = vweird.f32 %v3255_v3 }
 0xeec   :  { %v2493_v39 = vsel %vm2490_vm14, %v2492_v28, %v2488_v18  ;;  %3256 = vrcp.f32 %v2404_v35  ;;  %vm2502_vm1 = vmor %vm2500_vm0, %vm2501_vm15  ;;  %v2521_v24 = vand.u32 2147483648, %v2404_v35  ;;  %v2519_v50 = vand.u32 2147483647, %v2404_v35 }
 0xeed   :  { %v2494_v29 = vmul.f32 %v4293_v57, %v2493_v39  ;;  %v2497_v5 = vsub.f32 1.0, %v2496_v58  ;;  %vm2515_vm4 = vweird.f32 %v2404_v35 }
 0xeee   :  { %v2522_v45 = vor.u32 1.1754944e-38, %v2521_v24  ;;  %vm2520_vm7 = vcmp.eq.f32.partialorder %v2519_v50, 8.507059e+37 }
 0xeef   :  { %v2530_v0 = vsel %vm2332_vm5, %v2494_v29, 0.0  ;;  %v2498_v8 = vmul.f32 %v3255_v3, %v2497_v5 }
 0xef0   :  { %2538 = vst [vmem:[%s4359_s14 + $0x28] sm:$0xff] %v2530_v0 }
 0xef1   :  { %v2499_v49 = vadd.f32 %v3255_v3, %v2498_v8 }
 0xef2   :  { %v3257_v17 = vpop.eup %3256 }
 0xef3   :  { %v2503_v2 = vsel %vm2502_vm1, %v3255_v3, %v2499_v49  ;;  %v2511_v15 = vmul.f32 %v3257_v17, %v2404_v35  ;;  %vm2516_vm3 = vweird.f32 %v3257_v17 }
 0xef4   :  { %v2508_v57 = vsel %vm2505_vm2, %v2507_v40, %v2503_v2  ;;  %vm2517_vm6 = vmor %vm2515_vm4, %vm2516_vm3 }
 0xef5   :  { %v2509_v38 = vmul.f32 %v4297_v7, %v2508_v57  ;;  %v2512_v54 = vsub.f32 1.0, %v2511_v15 }
 0xef7   :  { %v2531_v33 = vsel %vm2332_vm5, %v2509_v38, 0.0  ;;  %v2513_v36 = vmul.f32 %v3257_v17, %v2512_v54 }
 0xef8   :  { %2539 = vst [vmem:[%s4359_s14 + $0x30] sm:$0xff] %v2531_v33 }
 0xef9   :  { %v2514_v25 = vadd.f32 %v3257_v17, %v2513_v36 }
 0xefb   :  { %v2518_v44 = vsel %vm2517_vm6, %v3257_v17, %v2514_v25 }
 0xefc   :  { %v2523_v34 = vsel %vm2520_vm7, %v2522_v45, %v2518_v44 }
 0xefd   :  { %v2524_v7 = vmul.f32 %v4301_v62, %v2523_v34 }
 0xeff   :  { %v2532_v47 = vsel %vm2332_vm5, %v2524_v7, 0.0 }
 0xf00   :  { %2540 = vst [vmem:[%s4359_s14 + $0x38] sm:$0xff] %v2532_v47 }

</bundles_post_ra>
